<compile_context>
chip_gen: v7x
topology: tpu7x:2x2x1
jax: 0.10.0
libtpu: 0.0.40
codegen_flags: <defaults>
</compile_context>

<pallas_src>
import jax
import jax.numpy as jnp
from jax.experimental import pallas as pl
from jax.experimental.pallas import tpu as pltpu

LATENT_DIM = 32      # opt.latent_dim (small synthetic value)
FEATURES = 64        # opt.features   (small synthetic value)
BATCH = 8
BN_EPS = 0.8
LEAKY_SLOPE = 0.2

HIDDEN = (128, 256, 512, 1024)


def _leaky_relu(x):
    return jnp.where(x > 0, x, LEAKY_SLOPE * x)


def generator_kernel(z_ref,
                     w1_ref, b1_ref,
                     w2_ref, g2_ref, be2_ref,
                     w3_ref, g3_ref, be3_ref,
                     w4_ref, g4_ref, be4_ref,
                     w5_ref, b5_ref,
                     out_ref):
    # block(latent_dim, 128, normalize=False): Linear + LeakyReLU
    x = z_ref[...].astype(jnp.bfloat16)
    h = jnp.dot(x, w1_ref[...], preferred_element_type=jnp.float32) + b1_ref[...]
    h = _leaky_relu(h)

    def bn_block(h, w_ref, g_ref, be_ref):
        # Linear (bias omitted: exactly cancelled by the train-mode BN mean subtraction)
        h = jnp.dot(h.astype(jnp.bfloat16), w_ref[...],
                    preferred_element_type=jnp.float32)
        # BatchNorm1d, training mode: biased batch statistics over the batch axis
        mean = jnp.mean(h, axis=0, keepdims=True)
        var = jnp.mean(jnp.square(h - mean), axis=0, keepdims=True)
        h = (h - mean) * jax.lax.rsqrt(var + BN_EPS)
        h = h * g_ref[...] + be_ref[...]
        # LeakyReLU(0.2)
        return _leaky_relu(h)

    h = bn_block(h, w2_ref, g2_ref, be2_ref)   # 128  -> 256
    h = bn_block(h, w3_ref, g3_ref, be3_ref)   # 256  -> 512
    h = bn_block(h, w4_ref, g4_ref, be4_ref)   # 512  -> 1024

    # Linear(1024, features) + Tanh
    out = jnp.dot(h.astype(jnp.bfloat16), w5_ref[...],
                  preferred_element_type=jnp.float32) + b5_ref[...]
    out_ref[...] = jnp.tanh(out)


def init_params(key):
    """Deterministic synthetic params.

    Linear weights stored pre-transposed as (in, out) in bfloat16 (halves HBM->VMEM
    DMA; the MXU consumes bf16 natively and accumulation stays f32 in-kernel).
    Biases / BN params stay f32 (tiny).
    """
    dims = [(LATENT_DIM, HIDDEN[0]),
            (HIDDEN[0], HIDDEN[1]),
            (HIDDEN[1], HIDDEN[2]),
            (HIDDEN[2], HIDDEN[3]),
            (HIDDEN[3], FEATURES)]
    linears = []
    for fin, fout in dims:
        key, kw, kb = jax.random.split(key, 3)
        bound = 1.0 / jnp.sqrt(jnp.float32(fin))
        w = jax.random.uniform(kw, (fin, fout), jnp.float32, -bound, bound)
        b = jax.random.uniform(kb, (1, fout), jnp.float32, -bound, bound)
        linears.append((w.astype(jnp.bfloat16), b))
    # BatchNorm1d affine params (PyTorch defaults: gamma=1, beta=0)
    bns = [(jnp.ones((1, d), jnp.float32), jnp.zeros((1, d), jnp.float32))
           for d in HIDDEN[1:]]
    return linears, bns


@jax.jit
def generator_forward(z, linears, bns):
    (w1, b1), (w2, _b2), (w3, _b3), (w4, _b4), (w5, b5) = linears
    (g2, be2), (g3, be3), (g4, be4) = bns
    # b2/b3/b4 are deliberately not passed: they feed directly into train-mode
    # BatchNorm and are cancelled exactly by the mean subtraction.
    args = (z,
            w1, b1,
            w2, g2, be2,
            w3, g3, be3,
            w4, g4, be4,
            w5, b5)
    vmem = pl.BlockSpec(memory_space=pltpu.MemorySpace.VMEM)
    img = pl.pallas_call(
        generator_kernel,
        out_shape=jax.ShapeDtypeStruct((z.shape[0], FEATURES), jnp.float32),
        in_specs=[vmem] * len(args),
        out_specs=vmem,
        compiler_params=pltpu.CompilerParams(
            # Explicit headroom; footprint today is ~1.6 MB bf16 weights + <64 KB acts,
            # safe on v5e/v6e/v7x scoped-VMEM defaults.
            vmem_limit_bytes=32 * 1024 * 1024),
    )(*args)
    # img.view(img.size(0), opt.features) is a no-op reshape here
    return img.reshape(z.shape[0], FEATURES)


if __name__ == "__main__":
    key = jax.random.PRNGKey(0)
    key_z, key_p = jax.random.split(key)
    z = jax.random.normal(key_z, (BATCH, LATENT_DIM), dtype=jnp.float32)
    linears, bns = init_params(key_p)

    img = generator_forward(z, linears, bns)
    img = jax.block_until_ready(img)

    assert img.shape == (BATCH, FEATURES)
    assert bool(jnp.all(jnp.isfinite(img)))
    assert bool(jnp.all(jnp.abs(img) <= 1.0))  # tanh output range
    print("KERNEL_OK")
</pallas_src>

<mosaic_0001>
module attributes {stable_mosaic.version = 11 : i64} {
  func.func @generator_kernel(%arg0: memref<8x32xf32, #tpu.memory_space<vmem>>, %arg1: memref<32x128xbf16, #tpu.memory_space<vmem>>, %arg2: memref<1x128xf32, #tpu.memory_space<vmem>>, %arg3: memref<128x256xbf16, #tpu.memory_space<vmem>>, %arg4: memref<1x256xf32, #tpu.memory_space<vmem>>, %arg5: memref<1x256xf32, #tpu.memory_space<vmem>>, %arg6: memref<256x512xbf16, #tpu.memory_space<vmem>>, %arg7: memref<1x512xf32, #tpu.memory_space<vmem>>, %arg8: memref<1x512xf32, #tpu.memory_space<vmem>>, %arg9: memref<512x1024xbf16, #tpu.memory_space<vmem>>, %arg10: memref<1x1024xf32, #tpu.memory_space<vmem>>, %arg11: memref<1x1024xf32, #tpu.memory_space<vmem>>, %arg12: memref<1024x64xbf16, #tpu.memory_space<vmem>>, %arg13: memref<1x64xf32, #tpu.memory_space<vmem>>, %arg14: memref<8x64xf32, #tpu.memory_space<vmem>>) attributes {dimension_semantics = [], scalar_prefetch = 0 : i64, scratch_operands = 0 : i64, tpu.core_type = #tpu.core_type<tc>} {
    %c0 = arith.constant 0 : index
    %c0_0 = arith.constant 0 : index
    %0 = vector.load %arg0[%c0, %c0_0] : memref<8x32xf32, #tpu.memory_space<vmem>>, vector<8x32xf32>
    %1 = arith.truncf %0 : vector<8x32xf32> to vector<8x32xbf16>
    %c0_1 = arith.constant 0 : index
    %c0_2 = arith.constant 0 : index
    %2 = vector.load %arg1[%c0_1, %c0_2] : memref<32x128xbf16, #tpu.memory_space<vmem>>, vector<32x128xbf16>
    %cst = arith.constant dense<0.000000e+00> : vector<8x128xf32>
    %3 = tpu.matmul %1, %2, %cst {dimension_numbers = #tpu.dot_dimension_numbers<[1], [0], [0], [1], [0, 0, 1, 1], [], []>} : vector<8x32xbf16>, vector<32x128xbf16>, vector<8x128xf32> -> vector<8x128xf32>
    %c0_3 = arith.constant 0 : index
    %c0_4 = arith.constant 0 : index
    %4 = vector.load %arg2[%c0_3, %c0_4] : memref<1x128xf32, #tpu.memory_space<vmem>>, vector<1x128xf32>
    %5 = vector.broadcast %4 : vector<1x128xf32> to vector<8x128xf32>
    %6 = arith.addf %3, %5 : vector<8x128xf32>
    %cst_5 = arith.constant 0.000000e+00 : f32
    %7 = vector.broadcast %cst_5 : f32 to vector<8x128xf32>
    %8 = arith.cmpf ogt, %6, %7 : vector<8x128xf32>
    %cst_6 = arith.constant 2.000000e-01 : f32
    %9 = vector.broadcast %cst_6 : f32 to vector<8x128xf32>
    %10 = arith.mulf %9, %6 : vector<8x128xf32>
    %11 = arith.select %8, %6, %10 : vector<8x128xi1>, vector<8x128xf32>
    %12 = arith.truncf %11 : vector<8x128xf32> to vector<8x128xbf16>
    %c0_7 = arith.constant 0 : index
    %c0_8 = arith.constant 0 : index
    %13 = vector.load %arg3[%c0_7, %c0_8] : memref<128x256xbf16, #tpu.memory_space<vmem>>, vector<128x256xbf16>
    %cst_9 = arith.constant dense<0.000000e+00> : vector<8x256xf32>
    %14 = tpu.matmul %12, %13, %cst_9 {dimension_numbers = #tpu.dot_dimension_numbers<[1], [0], [0], [1], [0, 0, 1, 1], [], []>} : vector<8x128xbf16>, vector<128x256xbf16>, vector<8x256xf32> -> vector<8x256xf32>
    %cst_10 = arith.constant dense<0.000000e+00> : vector<256xf32>
    %15 = vector.multi_reduction <add>, %14, %cst_10 [0] : vector<8x256xf32> to vector<256xf32>
    %16 = vector.shape_cast %15 : vector<256xf32> to vector<1x256xf32>
    %cst_11 = arith.constant 8.000000e+00 : f32
    %17 = vector.broadcast %cst_11 : f32 to vector<1x256xf32>
    %18 = arith.divf %16, %17 : vector<1x256xf32>
    %19 = vector.broadcast %18 : vector<1x256xf32> to vector<8x256xf32>
    %20 = arith.subf %14, %19 : vector<8x256xf32>
    %21 = arith.mulf %20, %20 : vector<8x256xf32>
    %cst_12 = arith.constant dense<0.000000e+00> : vector<256xf32>
    %22 = vector.multi_reduction <add>, %21, %cst_12 [0] : vector<8x256xf32> to vector<256xf32>
    %23 = vector.shape_cast %22 : vector<256xf32> to vector<1x256xf32>
    %cst_13 = arith.constant 8.000000e+00 : f32
    %24 = vector.broadcast %cst_13 : f32 to vector<1x256xf32>
    %25 = arith.divf %23, %24 : vector<1x256xf32>
    %26 = vector.broadcast %18 : vector<1x256xf32> to vector<8x256xf32>
    %27 = arith.subf %14, %26 : vector<8x256xf32>
    %cst_14 = arith.constant 8.000000e-01 : f32
    %28 = vector.broadcast %cst_14 : f32 to vector<1x256xf32>
    %29 = arith.addf %25, %28 : vector<1x256xf32>
    %30 = math.rsqrt %29 : vector<1x256xf32>
    %31 = vector.broadcast %30 : vector<1x256xf32> to vector<8x256xf32>
    %32 = arith.mulf %27, %31 : vector<8x256xf32>
    %c0_15 = arith.constant 0 : index
    %c0_16 = arith.constant 0 : index
    %33 = vector.load %arg4[%c0_15, %c0_16] : memref<1x256xf32, #tpu.memory_space<vmem>>, vector<1x256xf32>
    %34 = vector.broadcast %33 : vector<1x256xf32> to vector<8x256xf32>
    %35 = arith.mulf %32, %34 : vector<8x256xf32>
    %c0_17 = arith.constant 0 : index
    %c0_18 = arith.constant 0 : index
    %36 = vector.load %arg5[%c0_17, %c0_18] : memref<1x256xf32, #tpu.memory_space<vmem>>, vector<1x256xf32>
    %37 = vector.broadcast %36 : vector<1x256xf32> to vector<8x256xf32>
    %38 = arith.addf %35, %37 : vector<8x256xf32>
    %cst_19 = arith.constant 0.000000e+00 : f32
    %39 = vector.broadcast %cst_19 : f32 to vector<8x256xf32>
    %40 = arith.cmpf ogt, %38, %39 : vector<8x256xf32>
    %cst_20 = arith.constant 2.000000e-01 : f32
    %41 = vector.broadcast %cst_20 : f32 to vector<8x256xf32>
    %42 = arith.mulf %41, %38 : vector<8x256xf32>
    %43 = arith.select %40, %38, %42 : vector<8x256xi1>, vector<8x256xf32>
    %44 = arith.truncf %43 : vector<8x256xf32> to vector<8x256xbf16>
    %c0_21 = arith.constant 0 : index
    %c0_22 = arith.constant 0 : index
    %45 = vector.load %arg6[%c0_21, %c0_22] : memref<256x512xbf16, #tpu.memory_space<vmem>>, vector<256x512xbf16>
    %cst_23 = arith.constant dense<0.000000e+00> : vector<8x512xf32>
    %46 = tpu.matmul %44, %45, %cst_23 {dimension_numbers = #tpu.dot_dimension_numbers<[1], [0], [0], [1], [0, 0, 1, 1], [], []>} : vector<8x256xbf16>, vector<256x512xbf16>, vector<8x512xf32> -> vector<8x512xf32>
    %cst_24 = arith.constant dense<0.000000e+00> : vector<512xf32>
    %47 = vector.multi_reduction <add>, %46, %cst_24 [0] : vector<8x512xf32> to vector<512xf32>
    %48 = vector.shape_cast %47 : vector<512xf32> to vector<1x512xf32>
    %cst_25 = arith.constant 8.000000e+00 : f32
    %49 = vector.broadcast %cst_25 : f32 to vector<1x512xf32>
    %50 = arith.divf %48, %49 : vector<1x512xf32>
    %51 = vector.broadcast %50 : vector<1x512xf32> to vector<8x512xf32>
    %52 = arith.subf %46, %51 : vector<8x512xf32>
    %53 = arith.mulf %52, %52 : vector<8x512xf32>
    %cst_26 = arith.constant dense<0.000000e+00> : vector<512xf32>
    %54 = vector.multi_reduction <add>, %53, %cst_26 [0] : vector<8x512xf32> to vector<512xf32>
    %55 = vector.shape_cast %54 : vector<512xf32> to vector<1x512xf32>
    %cst_27 = arith.constant 8.000000e+00 : f32
    %56 = vector.broadcast %cst_27 : f32 to vector<1x512xf32>
    %57 = arith.divf %55, %56 : vector<1x512xf32>
    %58 = vector.broadcast %50 : vector<1x512xf32> to vector<8x512xf32>
    %59 = arith.subf %46, %58 : vector<8x512xf32>
    %cst_28 = arith.constant 8.000000e-01 : f32
    %60 = vector.broadcast %cst_28 : f32 to vector<1x512xf32>
    %61 = arith.addf %57, %60 : vector<1x512xf32>
    %62 = math.rsqrt %61 : vector<1x512xf32>
    %63 = vector.broadcast %62 : vector<1x512xf32> to vector<8x512xf32>
    %64 = arith.mulf %59, %63 : vector<8x512xf32>
    %c0_29 = arith.constant 0 : index
    %c0_30 = arith.constant 0 : index
    %65 = vector.load %arg7[%c0_29, %c0_30] : memref<1x512xf32, #tpu.memory_space<vmem>>, vector<1x512xf32>
    %66 = vector.broadcast %65 : vector<1x512xf32> to vector<8x512xf32>
    %67 = arith.mulf %64, %66 : vector<8x512xf32>
    %c0_31 = arith.constant 0 : index
    %c0_32 = arith.constant 0 : index
    %68 = vector.load %arg8[%c0_31, %c0_32] : memref<1x512xf32, #tpu.memory_space<vmem>>, vector<1x512xf32>
    %69 = vector.broadcast %68 : vector<1x512xf32> to vector<8x512xf32>
    %70 = arith.addf %67, %69 : vector<8x512xf32>
    %cst_33 = arith.constant 0.000000e+00 : f32
    %71 = vector.broadcast %cst_33 : f32 to vector<8x512xf32>
    %72 = arith.cmpf ogt, %70, %71 : vector<8x512xf32>
    %cst_34 = arith.constant 2.000000e-01 : f32
    %73 = vector.broadcast %cst_34 : f32 to vector<8x512xf32>
    %74 = arith.mulf %73, %70 : vector<8x512xf32>
    %75 = arith.select %72, %70, %74 : vector<8x512xi1>, vector<8x512xf32>
    %76 = arith.truncf %75 : vector<8x512xf32> to vector<8x512xbf16>
    %c0_35 = arith.constant 0 : index
    %c0_36 = arith.constant 0 : index
    %77 = vector.load %arg9[%c0_35, %c0_36] : memref<512x1024xbf16, #tpu.memory_space<vmem>>, vector<512x1024xbf16>
    %cst_37 = arith.constant dense<0.000000e+00> : vector<8x1024xf32>
    %78 = tpu.matmul %76, %77, %cst_37 {dimension_numbers = #tpu.dot_dimension_numbers<[1], [0], [0], [1], [0, 0, 1, 1], [], []>} : vector<8x512xbf16>, vector<512x1024xbf16>, vector<8x1024xf32> -> vector<8x1024xf32>
    %cst_38 = arith.constant dense<0.000000e+00> : vector<1024xf32>
    %79 = vector.multi_reduction <add>, %78, %cst_38 [0] : vector<8x1024xf32> to vector<1024xf32>
    %80 = vector.shape_cast %79 : vector<1024xf32> to vector<1x1024xf32>
    %cst_39 = arith.constant 8.000000e+00 : f32
    %81 = vector.broadcast %cst_39 : f32 to vector<1x1024xf32>
    %82 = arith.divf %80, %81 : vector<1x1024xf32>
    %83 = vector.broadcast %82 : vector<1x1024xf32> to vector<8x1024xf32>
    %84 = arith.subf %78, %83 : vector<8x1024xf32>
    %85 = arith.mulf %84, %84 : vector<8x1024xf32>
    %cst_40 = arith.constant dense<0.000000e+00> : vector<1024xf32>
    %86 = vector.multi_reduction <add>, %85, %cst_40 [0] : vector<8x1024xf32> to vector<1024xf32>
    %87 = vector.shape_cast %86 : vector<1024xf32> to vector<1x1024xf32>
    %cst_41 = arith.constant 8.000000e+00 : f32
    %88 = vector.broadcast %cst_41 : f32 to vector<1x1024xf32>
    %89 = arith.divf %87, %88 : vector<1x1024xf32>
    %90 = vector.broadcast %82 : vector<1x1024xf32> to vector<8x1024xf32>
    %91 = arith.subf %78, %90 : vector<8x1024xf32>
    %cst_42 = arith.constant 8.000000e-01 : f32
    %92 = vector.broadcast %cst_42 : f32 to vector<1x1024xf32>
    %93 = arith.addf %89, %92 : vector<1x1024xf32>
    %94 = math.rsqrt %93 : vector<1x1024xf32>
    %95 = vector.broadcast %94 : vector<1x1024xf32> to vector<8x1024xf32>
    %96 = arith.mulf %91, %95 : vector<8x1024xf32>
    %c0_43 = arith.constant 0 : index
    %c0_44 = arith.constant 0 : index
    %97 = vector.load %arg10[%c0_43, %c0_44] : memref<1x1024xf32, #tpu.memory_space<vmem>>, vector<1x1024xf32>
    %98 = vector.broadcast %97 : vector<1x1024xf32> to vector<8x1024xf32>
    %99 = arith.mulf %96, %98 : vector<8x1024xf32>
    %c0_45 = arith.constant 0 : index
    %c0_46 = arith.constant 0 : index
    %100 = vector.load %arg11[%c0_45, %c0_46] : memref<1x1024xf32, #tpu.memory_space<vmem>>, vector<1x1024xf32>
    %101 = vector.broadcast %100 : vector<1x1024xf32> to vector<8x1024xf32>
    %102 = arith.addf %99, %101 : vector<8x1024xf32>
    %cst_47 = arith.constant 0.000000e+00 : f32
    %103 = vector.broadcast %cst_47 : f32 to vector<8x1024xf32>
    %104 = arith.cmpf ogt, %102, %103 : vector<8x1024xf32>
    %cst_48 = arith.constant 2.000000e-01 : f32
    %105 = vector.broadcast %cst_48 : f32 to vector<8x1024xf32>
    %106 = arith.mulf %105, %102 : vector<8x1024xf32>
    %107 = arith.select %104, %102, %106 : vector<8x1024xi1>, vector<8x1024xf32>
    %108 = arith.truncf %107 : vector<8x1024xf32> to vector<8x1024xbf16>
    %c0_49 = arith.constant 0 : index
    %c0_50 = arith.constant 0 : index
    %109 = vector.load %arg12[%c0_49, %c0_50] : memref<1024x64xbf16, #tpu.memory_space<vmem>>, vector<1024x64xbf16>
    %cst_51 = arith.constant dense<0.000000e+00> : vector<8x64xf32>
    %110 = tpu.matmul %108, %109, %cst_51 {dimension_numbers = #tpu.dot_dimension_numbers<[1], [0], [0], [1], [0, 0, 1, 1], [], []>} : vector<8x1024xbf16>, vector<1024x64xbf16>, vector<8x64xf32> -> vector<8x64xf32>
    %c0_52 = arith.constant 0 : index
    %c0_53 = arith.constant 0 : index
    %111 = vector.load %arg13[%c0_52, %c0_53] : memref<1x64xf32, #tpu.memory_space<vmem>>, vector<1x64xf32>
    %112 = vector.broadcast %111 : vector<1x64xf32> to vector<8x64xf32>
    %113 = arith.addf %110, %112 : vector<8x64xf32>
    %114 = math.tanh %113 : vector<8x64xf32>
    %c0_54 = arith.constant 0 : index
    %c0_55 = arith.constant 0 : index
    %115 = vector.load %arg14[%c0_54, %c0_55] : memref<8x64xf32, #tpu.memory_space<vmem>>, vector<8x64xf32>
    tpu.vector_store %arg14[%c0_54, %c0_55], %114 {strides = array<i32>} : memref<8x64xf32, #tpu.memory_space<vmem>>, vector<8x64xf32>,
    return
  }
}

</mosaic_0001>

<bundles_post_ra>
// kernel: generator_forward.1
= control target key start
LH: loop header
LB: loop body
LE: loop exit
PB: predicated region body
PF: predicated region fallthrough
CT: control target
= control target key end

     0   :  { %19 = vsyncpa [#allocation3], 0  ;;  %s5301_s0 = inlined_call_operand.vmem [shape: f32[8,32], index: 0, kind: input, shape index: {}]   ;;  %s5302_s1 = inlined_call_operand.vmem [shape: bf16[32,128], index: 1, kind: input, shape index: {}]   ;;  %s5303_s2 = inlined_call_operand.vmem [shape: f32[1,128], index: 2, kind: input, shape index: {}]   ;;  %s5304_s3 = inlined_call_operand.vmem [shape: bf16[128,256], index: 3, kind: input, shape index: {}]   ;;  %s5305_s4 = inlined_call_operand.vmem [shape: f32[1,256], index: 4, kind: input, shape index: {}]   ;;  %s5306_s5 = inlined_call_operand.vmem [shape: f32[1,256], index: 5, kind: input, shape index: {}]   ;;  %s5307_s6 = inlined_call_operand.vmem [shape: bf16[256,512], index: 6, kind: input, shape index: {}]   ;;  %s5308_s7 = inlined_call_operand.vmem [shape: f32[1,512], index: 7, kind: input, shape index: {}]   ;;  %s5309_s8 = inlined_call_operand.vmem [shape: f32[1,512], index: 8, kind: input, shape index: {}]   ;;  %s5310_s9 = inlined_call_operand.hbm [shape: bf16[512,1024], index: 9, kind: input, shape index: {}]   ;;  %s5311_s10 = inlined_call_operand.vmem [shape: f32[1,1024], index: 10, kind: input, shape index: {}]   ;;  %s5312_s11 = inlined_call_operand.vmem [shape: f32[1,1024], index: 11, kind: input, shape index: {}]   ;;  %s5313_s12 = inlined_call_operand.vmem [shape: bf16[1024,64], index: 12, kind: input, shape index: {}]   ;;  %s5314_s13 = inlined_call_operand.vmem [shape: f32[1,64], index: 13, kind: input, shape index: {}]   ;;  %s5315_s14 = inlined_call_operand.hbm [shape: f32[8,64], index: 14, kind: output, shape index: {}]  }
   0x1   :  { %20 = vsyncpa [#allocation4], 0  ;;  %s4594_s29 = smov [#allocation2]   ;;  %s4546_s17 = scalar_lea.hbm %s5310_s9, 32768 }
   0x2   :  { %s44_s30 = sshll.u32 %s4594_s29, 4  ;;  %p4547_p0 = scmp.ne.s32.totalorder %s5310_s9, %s4546_s17  ;;  %s45_s30 = int_to_ptr.vmem [resolvable:$true] %s44_s30 }
   0x3   :  { %p4550_p1 = scmp.lt.u32.totalorder %s4546_s17, %s5310_s9 }
   0x5   :  { %p4552_p2 = pnand %p4550_p1, %p4547_p0 }
   0x7   :  { %4555 = shalt.err (!%p4552_p2)
}
   0x8   :  { %s4556_s22 = scalar_lea.vmem %s45_s30, 32768  ;;  %p4561_p4 = scmp.lt.s32.totalorder %s45_s30, %s45_s30 }
   0x9   :  { %p4557_p3 = scmp.ne.s32.totalorder %s45_s30, %s4556_s22  ;;  %p4562_p5 = scmp.lt.s32.totalorder %s4556_s22, %s4556_s22 }
   0xb   :  { %p4563_p6 = por %p4562_p5, %p4561_p4 }
   0xd   :  { %p4564_p7 = pnand %p4563_p6, %p4557_p3 }
   0xf   :  { %4567 = shalt.err (!%p4564_p7)
}
  0x10   :  { %s4595_s23 = smov 512   ;;  %s4596_s24 = smov 32  }
  0x11   :  { %50 = dma.hbm_to_vmem [thread:$0]  %s5310_s9, 32768, %s45_s30, [#allocation3], %s4595_s23, %s4595_s23, %s4596_s24  }
  0x12   :  { %4590 = dma.done.wait [#allocation3], 32768  }
  0x13   :  { %4591 = vsyncadd [#allocation3], 4294934528  ;;  %v4597_v0 = vmov 0.0   ;;  %vm4598_vm0 = vmmov 0   ;;  %v4330_v1 = vld [vmem:[%s5302_s1] sm:$0xff]   ;;  %v4331_v2 = vld [vmem:[%s5302_s1 + $0x8] sm:$0xff]  }
  0x14   :  { %4299 = vmatprep.subr.bf16.mxu0 %v4597_v0  ;;  %4303 = vmatprep.mubr.msk.bf16.mxu0 %vm4598_vm0, %v4597_v0  ;;  %v63_v3 = vld [vmem:[%s5301_s0] sm:$0xff]  ;;  %v4335_v6 = vld [vmem:[%s5304_s3 + $0x14] ss:$8 sps:$4 sm:$0xff]   ;;  %vm88_vm1 = vcmask 261120   ;;  %v4337_v8 = vld [vmem:[%s5304_s3 + $0x10] ss:$8 sps:$4 sm:$0xff]  }
  0x15   :  { %4300 = vmatpush3.bf16.msra.mxu0 %v4330_v1  ;;  %v4332_v4 = vld [vmem:[%s5304_s3 + $0x4] ss:$8 sps:$4 sm:$0xff]   ;;  %v4334_v5 = vld [vmem:[%s5304_s3] ss:$8 sps:$4 sm:$0xff]   ;;  %v64_v7 = vpack.c.bf16 %v63_v3, %v63_v3  ;;  %v4341_v11 = vld [vmem:[%s5304_s3 + $0x34] ss:$8 sps:$4 sm:$0xff]  }
  0x16   :  { %4301 = vmatprep.subr.bf16.mxu0 %v4597_v0  ;;  %232 = vmatprep.subr.bf16.mxu1 %v4332_v4  ;;  %v4338_v9 = vld [vmem:[%s5304_s3 + $0x24] ss:$8 sps:$4 sm:$0xff]   ;;  %v4340_v10 = vld [vmem:[%s5304_s3 + $0x20] ss:$8 sps:$4 sm:$0xff]   ;;  %v4343_v12 = vld [vmem:[%s5304_s3 + $0x30] ss:$8 sps:$4 sm:$0xff]  }
  0x17   :  { %233 = vmatpush1.bf16.msra.mxu1 %v4334_v5  ;;  %v4344_v13 = vld [vmem:[%s5304_s3 + $0x44] ss:$8 sps:$4 sm:$0xff]   ;;  %v4346_v14 = vld [vmem:[%s5304_s3 + $0x40] ss:$8 sps:$4 sm:$0xff]   ;;  %v4347_v15 = vld [vmem:[%s5304_s3 + $0x54] ss:$8 sps:$4 sm:$0xff]  }
  0x18   :  { %234 = vmatprep.subr.bf16.mxu1 %v4335_v6  ;;  %v4349_v16 = vld [vmem:[%s5304_s3 + $0x50] ss:$8 sps:$4 sm:$0xff]   ;;  %v4350_v17 = vld [vmem:[%s5304_s3 + $0x64] ss:$8 sps:$4 sm:$0xff]   ;;  %v4352_v18 = vld [vmem:[%s5304_s3 + $0x60] ss:$8 sps:$4 sm:$0xff]  }
  0x19   :  { %4302 = vmatpush3.bf16.msra.mxu0 %v4331_v2  ;;  %v4353_v19 = vld [vmem:[%s5304_s3 + $0x74] ss:$8 sps:$4 sm:$0xff]   ;;  %v4355_v20 = vld [vmem:[%s5304_s3 + $0x70] ss:$8 sps:$4 sm:$0xff]   ;;  %v4599_v21 = vmov 0  }
  0x1a   :  { %264 = vmatprep.mubr.bf16.mxu1 %v4599_v21  ;;  %v4356_v22 = vld [vmem:[%s5307_s6] ss:$16 sps:$4 sm:$0xff]   ;;  %v4358_v23 = vld [vmem:[%s5307_s6 + $0x4] ss:$16 sps:$4 sm:$0xff]   ;;  %v4361_v24 = vld [vmem:[%s5307_s6 + $0xc] ss:$16 sps:$4 sm:$0xff]  }
  0x1b   :  { %235 = vmatpush1.bf16.msra.mxu1 %v4337_v8  ;;  %v4364_v25 = vld [vmem:[%s5307_s6 + $0x24] ss:$16 sps:$4 sm:$0xff]   ;;  %732 = vmatprep.subr.bf16.mxu0 %v4358_v23  ;;  %v4362_v26 = vld [vmem:[%s5307_s6 + $0x20] ss:$16 sps:$4 sm:$0xff]   ;;  %v4359_v35 = vld [vmem:[%s5307_s6 + $0x8] ss:$16 sps:$4 sm:$0xff]  }
  0x1c   :  { %4304 = vmatmul.mubr.msk.bf16.vlgmr.msra.gmra.mrb[0].mxu0 %vm88_vm1, %v64_v7  ;;  %236 = vmatprep.subr.bf16.mxu1 %v4338_v9  ;;  %v3803_v27 = vld [vmem:[%s5303_s2] ss:$0 sm:$0xff]  ;;  %v4367_v37 = vld [vmem:[%s5307_s6 + $0x2c] ss:$16 sps:$4 sm:$0xff]   ;;  %v4365_v38 = vld [vmem:[%s5307_s6 + $0x28] ss:$16 sps:$4 sm:$0xff]  }
  0x1d   :  { %733 = vmatpush1.bf16.msra.mxu0 %v4356_v22  ;;  %v4370_v39 = vld [vmem:[%s5307_s6 + $0x44] ss:$16 sps:$4 sm:$0xff]   ;;  %v4373_v40 = vld [vmem:[%s5307_s6 + $0x4c] ss:$16 sps:$4 sm:$0xff]   ;;  %v4368_v41 = vld [vmem:[%s5307_s6 + $0x40] ss:$16 sps:$4 sm:$0xff]  }
  0x1e   :  { %734 = vmatprep.subr.bf16.mxu0 %v4364_v25  ;;  %v4371_v42 = vld [vmem:[%s5307_s6 + $0x48] ss:$16 sps:$4 sm:$0xff]   ;;  %v4376_v43 = vld [vmem:[%s5307_s6 + $0x64] ss:$16 sps:$4 sm:$0xff]   ;;  %v4379_v44 = vld [vmem:[%s5307_s6 + $0x6c] ss:$16 sps:$4 sm:$0xff]  }
  0x1f   :  { %237 = vmatpush1.bf16.msra.mxu1 %v4340_v10  ;;  %v4374_v45 = vld [vmem:[%s5307_s6 + $0x60] ss:$16 sps:$4 sm:$0xff]   ;;  %v4377_v46 = vld [vmem:[%s5307_s6 + $0x68] ss:$16 sps:$4 sm:$0xff]   ;;  %v4382_v47 = vld [vmem:[%s5307_s6 + $0x84] ss:$16 sps:$4 sm:$0xff]  }
  0x20   :  { %238 = vmatprep.subr.bf16.mxu1 %v4341_v11  ;;  %v4385_v48 = vld [vmem:[%s5307_s6 + $0x8c] ss:$16 sps:$4 sm:$0xff]   ;;  %v4380_v49 = vld [vmem:[%s5307_s6 + $0x80] ss:$16 sps:$4 sm:$0xff]   ;;  %v4383_v50 = vld [vmem:[%s5307_s6 + $0x88] ss:$16 sps:$4 sm:$0xff]  }
  0x21   :  { %735 = vmatpush1.bf16.msra.mxu0 %v4362_v26  ;;  %v4388_v51 = vld [vmem:[%s5307_s6 + $0xa4] ss:$16 sps:$4 sm:$0xff]   ;;  %v4391_v52 = vld [vmem:[%s5307_s6 + $0xac] ss:$16 sps:$4 sm:$0xff]   ;;  %v4386_v53 = vld [vmem:[%s5307_s6 + $0xa0] ss:$16 sps:$4 sm:$0xff]  }
  0x22   :  { %736 = vmatprep.subr.bf16.mxu0 %v4370_v39  ;;  %v4389_v54 = vld [vmem:[%s5307_s6 + $0xa8] ss:$16 sps:$4 sm:$0xff]   ;;  %v4394_v55 = vld [vmem:[%s5307_s6 + $0xc4] ss:$16 sps:$4 sm:$0xff]   ;;  %v4397_v56 = vld [vmem:[%s5307_s6 + $0xcc] ss:$16 sps:$4 sm:$0xff]  }
  0x23   :  { %239 = vmatpush1.bf16.msra.mxu1 %v4343_v12  ;;  %v4392_v57 = vld [vmem:[%s5307_s6 + $0xc0] ss:$16 sps:$4 sm:$0xff]   ;;  %v4395_v58 = vld [vmem:[%s5307_s6 + $0xc8] ss:$16 sps:$4 sm:$0xff]   ;;  %v4400_v59 = vld [vmem:[%s5307_s6 + $0xe4] ss:$16 sps:$4 sm:$0xff]  }
  0x24   :  { %240 = vmatprep.subr.bf16.mxu1 %v4344_v13  ;;  %v4403_v60 = vld [vmem:[%s5307_s6 + $0xec] ss:$16 sps:$4 sm:$0xff]   ;;  %v4398_v61 = vld [vmem:[%s5307_s6 + $0xe0] ss:$16 sps:$4 sm:$0xff]   ;;  %v4401_v62 = vld [vmem:[%s5307_s6 + $0xe8] ss:$16 sps:$4 sm:$0xff]  }
  0x25   :  { %737 = vmatpush1.bf16.msra.mxu0 %v4368_v41  ;;  %v4406_v63 = vld [vmem:[%s5307_s6 + $0x104] ss:$16 sps:$4 sm:$0xff]   ;;  %v4409_v0 = vld [vmem:[%s5307_s6 + $0x10c] ss:$16 sps:$4 sm:$0xff]   ;;  %v4404_v1 = vld [vmem:[%s5307_s6 + $0x100] ss:$16 sps:$4 sm:$0xff]  }
  0x26   :  { %738 = vmatprep.subr.bf16.mxu0 %v4376_v43  ;;  %v4407_v2 = vld [vmem:[%s5307_s6 + $0x108] ss:$16 sps:$4 sm:$0xff]   ;;  %v4412_v3 = vld [vmem:[%s5307_s6 + $0x124] ss:$16 sps:$4 sm:$0xff]   ;;  %v4415_v4 = vld [vmem:[%s5307_s6 + $0x12c] ss:$16 sps:$4 sm:$0xff]  }
  0x27   :  { %241 = vmatpush1.bf16.msra.mxu1 %v4346_v14  ;;  %v4410_v5 = vld [vmem:[%s5307_s6 + $0x120] ss:$16 sps:$4 sm:$0xff]   ;;  %v4413_v6 = vld [vmem:[%s5307_s6 + $0x128] ss:$16 sps:$4 sm:$0xff]   ;;  %v4418_v7 = vld [vmem:[%s5307_s6 + $0x144] ss:$16 sps:$4 sm:$0xff]  }
  0x28   :  { %242 = vmatprep.subr.bf16.mxu1 %v4347_v15  ;;  %v4421_v8 = vld [vmem:[%s5307_s6 + $0x14c] ss:$16 sps:$4 sm:$0xff]   ;;  %v4416_v9 = vld [vmem:[%s5307_s6 + $0x140] ss:$16 sps:$4 sm:$0xff]   ;;  %v4419_v10 = vld [vmem:[%s5307_s6 + $0x148] ss:$16 sps:$4 sm:$0xff]  }
  0x29   :  { %739 = vmatpush1.bf16.msra.mxu0 %v4374_v45  ;;  %v4424_v11 = vld [vmem:[%s5307_s6 + $0x164] ss:$16 sps:$4 sm:$0xff]   ;;  %v4427_v12 = vld [vmem:[%s5307_s6 + $0x16c] ss:$16 sps:$4 sm:$0xff]   ;;  %v4422_v13 = vld [vmem:[%s5307_s6 + $0x160] ss:$16 sps:$4 sm:$0xff]  }
  0x2a   :  { %740 = vmatprep.subr.bf16.mxu0 %v4382_v47  ;;  %v4425_v14 = vld [vmem:[%s5307_s6 + $0x168] ss:$16 sps:$4 sm:$0xff]   ;;  %v4430_v15 = vld [vmem:[%s5307_s6 + $0x184] ss:$16 sps:$4 sm:$0xff]   ;;  %v4439_v22 = vld [vmem:[%s5307_s6 + $0x1ac] ss:$16 sps:$4 sm:$0xff]  }
  0x2b   :  { %243 = vmatpush1.bf16.msra.mxu1 %v4349_v16  ;;  %v4433_v16 = vld [vmem:[%s5307_s6 + $0x18c] ss:$16 sps:$4 sm:$0xff]   ;;  %v4437_v21 = vld [vmem:[%s5307_s6 + $0x1a8] ss:$16 sps:$4 sm:$0xff]   ;;  %v4442_v23 = vld [vmem:[%s5307_s6 + $0x1c4] ss:$16 sps:$4 sm:$0xff]  }
  0x2c   :  { %244 = vmatprep.subr.bf16.mxu1 %v4350_v17  ;;  %v4428_v17 = vld [vmem:[%s5307_s6 + $0x180] ss:$16 sps:$4 sm:$0xff]   ;;  %v4443_v26 = vld [vmem:[%s5307_s6 + $0x1c8] ss:$16 sps:$4 sm:$0xff]   ;;  %vm3786_vm1 = vcmask 523264  }
  0x2d   :  { %741 = vmatpush1.bf16.msra.mxu0 %v4380_v49  ;;  %v4440_v25 = vld [vmem:[%s5307_s6 + $0x1c0] ss:$16 sps:$4 sm:$0xff]  }
  0x2e   :  { %742 = vmatprep.subr.bf16.mxu0 %v4388_v51 }
  0x2f   :  { %245 = vmatpush1.bf16.msra.mxu1 %v4352_v18  ;;  %v4431_v18 = vld [vmem:[%s5307_s6 + $0x188] ss:$16 sps:$4 sm:$0xff]  }
  0x30   :  { %246 = vmatprep.subr.bf16.mxu1 %v4353_v19  ;;  %v4436_v19 = vld [vmem:[%s5307_s6 + $0x1a4] ss:$16 sps:$4 sm:$0xff]  }
  0x31   :  { %743 = vmatpush1.bf16.msra.mxu0 %v4386_v53 }
  0x32   :  { %744 = vmatprep.subr.bf16.mxu0 %v4394_v55 }
  0x33   :  { %247 = vmatpush1.bf16.msra.mxu1 %v4355_v20  ;;  %v4434_v20 = vld [vmem:[%s5307_s6 + $0x1a0] ss:$16 sps:$4 sm:$0xff]  }
  0x34   :  { %773 = vmatprep.subr.bf16.mxu1 %v4361_v24  ;;  %v4445_v24 = vld [vmem:[%s5307_s6 + $0x1cc] ss:$16 sps:$4 sm:$0xff]  }
  0x35   :  { %745 = vmatpush1.bf16.msra.mxu0 %v4392_v57 }
  0x36   :  { %746 = vmatprep.subr.bf16.mxu0 %v4400_v59 }
  0x39   :  { %747 = vmatpush1.bf16.msra.mxu0 %v4398_v61 }
  0x3a   :  { %748 = vmatprep.subr.bf16.mxu0 %v4406_v63 }
  0x3d   :  { %749 = vmatpush1.bf16.msra.mxu0 %v4404_v1 }
  0x3e   :  { %750 = vmatprep.subr.bf16.mxu0 %v4412_v3 }
  0x41   :  { %751 = vmatpush1.bf16.msra.mxu0 %v4410_v5 }
  0x42   :  { %752 = vmatprep.subr.bf16.mxu0 %v4418_v7 }
  0x45   :  { %753 = vmatpush1.bf16.msra.mxu0 %v4416_v9 }
  0x46   :  { %754 = vmatprep.subr.bf16.mxu0 %v4424_v11 }
  0x49   :  { %755 = vmatpush1.bf16.msra.mxu0 %v4422_v13 }
  0x4a   :  { %756 = vmatprep.subr.bf16.mxu0 %v4430_v15 }
  0x4d   :  { %757 = vmatpush1.bf16.msra.mxu0 %v4428_v17 }
  0x4e   :  { %758 = vmatprep.subr.bf16.mxu0 %v4436_v19 }
  0x51   :  { %759 = vmatpush1.bf16.msra.mxu0 %v4434_v20 }
  0x52   :  { %760 = vmatprep.subr.bf16.mxu0 %v4442_v23 }
  0x55   :  { %761 = vmatpush1.bf16.msra.mxu0 %v4440_v25 }
  0xef   :  { %v126_v28 = vpop.f32.mrb[0].mxu0 }
  0xf0   :  { %v127_v29 = vadd.f32 %v3803_v27, %v126_v28  ;;  %v4305_v30 = vpop.f32.mrb[1].mxu0  ;;  %v4448_v27 = vld [vmem:[%s5307_s6 + $0x1e4] ss:$16 sps:$4 sm:$0xff]   ;;  %v4451_v28 = vld [vmem:[%s5307_s6 + $0x1ec] ss:$16 sps:$4 sm:$0xff]  }
  0xf1   :  { %v129_v31 = vpop.f32.mrb[2].mxu0  ;;  %762 = vmatprep.subr.bf16.mxu0 %v4448_v27  ;;  %v4449_v30 = vld [vmem:[%s5307_s6 + $0x1e8] ss:$16 sps:$4 sm:$0xff]  }
  0xf2   :  { %vm132_vm2 = vcmp.gt.f32.partialorder %v127_v29, 0.0  ;;  %v133_v32 = vmul.f32 0.2, %v127_v29  ;;  %v4306_v33 = vpop.f32.mrb[3].mxu0  ;;  %v4940_v31 = vld [vmem:[#allocation2] sm:$0xff] }
  0xf3   :  { %v4944_v33 = vld [vmem:[#allocation2 + $0x8] sm:$0xff] }
  0xf4   :  { %v134_v34 = vsel %vm132_vm2, %v127_v29, %v133_v32  ;;  %v4446_v29 = vld [vmem:[%s5307_s6 + $0x1e0] ss:$16 sps:$4 sm:$0xff]  }
  0xf5   :  { %v135_v36 = vpack.c.bf16 %v134_v34, %v134_v34  ;;  %763 = vmatpush1.bf16.msra.mxu0 %v4446_v29  ;;  %v4942_v32 = vld [vmem:[#allocation2 + $0x20] sm:$0xff] }
  0xf6   :  { %v3887_v34 = vcombine.low %v4940_v31, %v4942_v32 }
  0xf7   :  { %265 = vmatmul.mubr.bf16.vlgmr.msra.gmra.mrb[0].mxu1 %v135_v36  ;;  %v4950_v36 = vld [vmem:[#allocation2 + $0x28] sm:$0xff] }
  0xf8   :  { %774 = vmatpush1.bf16.msra.mxu1 %v4359_v35  ;;  %v3888_v35 = vcombine.high %v4940_v31, %v4942_v32  ;;  %v982_v31 = vld [vmem:[#allocation2 + $0xc0] sm:$0xff] }
  0xf9   :  { %775 = vmatprep.subr.bf16.mxu1 %v4367_v37  ;;  %v3889_v37 = vcombine.low %v4944_v33, %v4950_v36  ;;  %v986_v32 = vld [vmem:[#allocation2 + $0xe0] sm:$0xff] }
  0xfa   :  { %2494 = vmatprep.subr.bf16.mxu0 %v3888_v35 }
  0xfc   :  { %776 = vmatpush1.bf16.msra.mxu1 %v4365_v38  ;;  %v3890_v38 = vcombine.high %v4944_v33, %v4950_v36  ;;  %v983_v33 = vld [vmem:[#allocation2 + $0xc8] sm:$0xff] }
  0xfd   :  { %777 = vmatprep.subr.bf16.mxu1 %v4373_v40  ;;  %v987_v36 = vld [vmem:[#allocation2 + $0xe8] sm:$0xff] }
 0x100   :  { %778 = vmatpush1.bf16.msra.mxu1 %v4371_v42 }
 0x101   :  { %779 = vmatprep.subr.bf16.mxu1 %v4379_v44 }
 0x104   :  { %780 = vmatpush1.bf16.msra.mxu1 %v4377_v46 }
 0x105   :  { %781 = vmatprep.subr.bf16.mxu1 %v4385_v48 }
 0x108   :  { %782 = vmatpush1.bf16.msra.mxu1 %v4383_v50 }
 0x109   :  { %783 = vmatprep.subr.bf16.mxu1 %v4391_v52 }
 0x10c   :  { %784 = vmatpush1.bf16.msra.mxu1 %v4389_v54 }
 0x10d   :  { %785 = vmatprep.subr.bf16.mxu1 %v4397_v56 }
 0x110   :  { %786 = vmatpush1.bf16.msra.mxu1 %v4395_v58 }
 0x111   :  { %787 = vmatprep.subr.bf16.mxu1 %v4403_v60 }
 0x114   :  { %788 = vmatpush1.bf16.msra.mxu1 %v4401_v62 }
 0x115   :  { %789 = vmatprep.subr.bf16.mxu1 %v4409_v0 }
 0x118   :  { %790 = vmatpush1.bf16.msra.mxu1 %v4407_v2 }
 0x119   :  { %791 = vmatprep.subr.bf16.mxu1 %v4415_v4 }
 0x11c   :  { %792 = vmatpush1.bf16.msra.mxu1 %v4413_v6 }
 0x11d   :  { %793 = vmatprep.subr.bf16.mxu1 %v4421_v8 }
 0x120   :  { %794 = vmatpush1.bf16.msra.mxu1 %v4419_v10  ;;  %v314_v10 = vlaneseq }
 0x121   :  { %795 = vmatprep.subr.bf16.mxu1 %v4427_v12 }
 0x124   :  { %796 = vmatpush1.bf16.msra.mxu1 %v4425_v14  ;;  %v4956_v14 = vshrl.u32 %v314_v10, 7 }
 0x125   :  { %797 = vmatprep.subr.bf16.mxu1 %v4433_v16  ;;  %v312_v16 = vld [vmem:[%s5305_s4] sm:$0x3] }
 0x126   :  { %v4959_v15 = vsub.s32 0, %v4956_v14  ;;  %v4965_v17 = vsub.s32 1, %v4956_v14 }
 0x128   :  { %798 = vmatpush1.bf16.msra.mxu1 %v4431_v18  ;;  %v326_v18 = vld [vmem:[%s5306_s5] sm:$0x3]  ;;  %v317_v19 = vrot.slane %v312_v16, %v4959_v15 }
 0x129   :  { %799 = vmatprep.subr.bf16.mxu1 %v4439_v22 }
 0x12c   :  { %800 = vmatpush1.bf16.msra.mxu1 %v4437_v21  ;;  %v321_v21 = vrot.slane %v312_v16, %v4965_v17  ;;  %v1010_v16 = vld [vmem:[#allocation2 + $0x1a0] sm:$0xff] }
 0x12d   :  { %801 = vmatprep.subr.bf16.mxu1 %v4445_v24  ;;  %v331_v24 = vrot.slane %v326_v18, %v4959_v15 }
 0x130   :  { %802 = vmatpush1.bf16.msra.mxu1 %v4443_v26  ;;  %v335_v26 = vrot.slane %v326_v18, %v4965_v17  ;;  %v1007_v18 = vld [vmem:[#allocation2 + $0x188] sm:$0xff] }
 0x131   :  { %803 = vmatprep.subr.bf16.mxu1 %v4451_v28 }
 0x134   :  { %804 = vmatpush1.bf16.msra.mxu1 %v4449_v30 }
 0x135   :  { %2576 = vmatprep.subr.bf16.mxu1 %v3890_v38 }
 0x1ca   :  { %v266_v39 = vpop.f32.mrb[0].mxu1 }
 0x1cb   :  { %v273_v40 = vrot.slane %v266_v39, 4  ;;  %v268_v41 = vpop.f32.mrb[1].mxu1 }
 0x1cc   :  { %v279_v42 = vrot.slane %v268_v41, 4  ;;  %v270_v43 = vpop.f32.mrb[2].mxu1 }
 0x1cd   :  { %v274_v44 = vadd.f32 %v273_v40, %v266_v39  ;;  %v271_v45 = vpop.f32.mrb[3].mxu1  ;;  %v971_v43 = vld [vmem:[#allocation2 + $0x68] sm:$0xff] }
 0x1ce   :  { %v280_v46 = vadd.f32 %v279_v42, %v268_v41  ;;  %v967_v42 = vld [vmem:[#allocation2 + $0x48] sm:$0xff] }
 0x1cf   :  { %v275_v47 = vrot.slane %v274_v44, 2 }
 0x1d0   :  { %v281_v48 = vrot.slane %v280_v46, 2 }
 0x1d1   :  { %v276_v49 = vadd.f32 %v275_v47, %v274_v44 }
 0x1d2   :  { %v282_v50 = vadd.f32 %v281_v48, %v280_v46  ;;  %v3898_v48 = vcombine.high %v967_v42, %v971_v43 }
 0x1d3   :  { %v277_v51 = vrot.slane %v276_v49, 1 }
 0x1d4   :  { %v283_v52 = vrot.slane %v282_v50, 1 }
 0x1d5   :  { %v278_v53 = vadd.f32 %v277_v51, %v276_v49  ;;  %v974_v51 = vld [vmem:[#allocation2 + $0x80] sm:$0xff] }
 0x1d6   :  { %v284_v54 = vadd.f32 %v283_v52, %v282_v50  ;;  %v3897_v50 = vcombine.low %v967_v42, %v971_v43  ;;  %v978_v52 = vld [vmem:[#allocation2 + $0xa0] sm:$0xff]  ;;  %v1027_v42 = vld [vmem:[#allocation2 + $0x228] sm:$0xff] }
 0x1d7   :  { %v286_v55 = vmul.f32 0.125, %v278_v53  ;;  %v975_v53 = vld [vmem:[#allocation2 + $0x88] sm:$0xff] }
 0x1d8   :  { %v287_v56 = vmul.f32 0.125, %v284_v54  ;;  %v3904_v54 = vcombine.high %v974_v51, %v978_v52 }
 0x1d9   :  { %v288_v57 = vsub.f32 %v266_v39, %v286_v55  ;;  %v966_v39 = vld [vmem:[#allocation2 + $0x40] sm:$0xff]  ;;  %v979_v55 = vld [vmem:[#allocation2 + $0xa8] sm:$0xff] }
 0x1da   :  { %v289_v58 = vsub.f32 %v268_v41, %v287_v56  ;;  %v970_v41 = vld [vmem:[#allocation2 + $0x60] sm:$0xff]  ;;  %v3903_v56 = vcombine.low %v974_v51, %v978_v52 }
 0x1db   :  { %v290_v59 = vmul.f32 %v288_v57, %v288_v57  ;;  %v3896_v47 = vcombine.high %v966_v39, %v970_v41  ;;  %v3895_v49 = vcombine.low %v966_v39, %v970_v41  ;;  %v1026_v39 = vld [vmem:[#allocation2 + $0x220] sm:$0xff] }
 0x1dc   :  { %v291_v60 = vmul.f32 %v289_v58, %v289_v58 }
 0x1dd   :  { %v292_v61 = vrot.slane %v290_v59, 4 }
 0x1de   :  { %v298_v62 = vrot.slane %v291_v60, 4 }
 0x1df   :  { %v293_v63 = vadd.f32 %v292_v61, %v290_v59  ;;  %v3913_v59 = vcombine.low %v983_v33, %v987_v36  ;;  %v990_v61 = vld [vmem:[#allocation2 + $0x100] sm:$0xff] }
 0x1e0   :  { %v299_v0 = vadd.f32 %v298_v62, %v291_v60  ;;  %v3914_v60 = vcombine.high %v983_v33, %v987_v36  ;;  %v994_v62 = vld [vmem:[#allocation2 + $0x120] sm:$0xff] }
 0x1e1   :  { %v294_v1 = vrot.slane %v293_v63, 2  ;;  %v1050_v36 = vld [vmem:[#allocation2 + $0x2e0] sm:$0xff] }
 0x1e2   :  { %v300_v2 = vrot.slane %v299_v0, 2 }
 0x1e3   :  { %v295_v3 = vadd.f32 %v294_v1, %v293_v63  ;;  %v991_v63 = vld [vmem:[#allocation2 + $0x108] sm:$0xff] }
 0x1e4   :  { %v301_v4 = vadd.f32 %v300_v2, %v299_v0  ;;  %v3920_v0 = vcombine.high %v990_v61, %v994_v62  ;;  %v995_v1 = vld [vmem:[#allocation2 + $0x128] sm:$0xff]  ;;  %v3919_v2 = vcombine.low %v990_v61, %v994_v62 }
 0x1e5   :  { %v296_v5 = vrot.slane %v295_v3, 1 }
 0x1e6   :  { %v302_v6 = vrot.slane %v301_v4, 1 }
 0x1e7   :  { %v297_v7 = vadd.f32 %v296_v5, %v295_v3  ;;  %v3921_v3 = vcombine.low %v991_v63, %v995_v1  ;;  %v998_v5 = vld [vmem:[#allocation2 + $0x140] sm:$0xff] }
 0x1e8   :  { %v303_v8 = vadd.f32 %v302_v6, %v301_v4  ;;  %v3922_v4 = vcombine.high %v991_v63, %v995_v1  ;;  %v1002_v6 = vld [vmem:[#allocation2 + $0x160] sm:$0xff] }
 0x1e9   :  { %v304_v9 = vmul.f32 0.125, %v297_v7  ;;  %v999_v7 = vld [vmem:[#allocation2 + $0x148] sm:$0xff]  ;;  %v3927_v10 = vcombine.low %v998_v5, %v1002_v6  ;;  %v1058_v1 = vld [vmem:[#allocation2 + $0x320] sm:$0xff] }
 0x1ea   :  { %v305_v11 = vmul.f32 0.125, %v303_v8  ;;  %v3928_v8 = vcombine.high %v998_v5, %v1002_v6 }
 0x1eb   :  { %v306_v12 = vadd.f32 0.8, %v304_v9  ;;  %v1003_v9 = vld [vmem:[#allocation2 + $0x168] sm:$0xff] }
 0x1ec   :  { %v307_v13 = vadd.f32 0.8, %v305_v11  ;;  %v3929_v11 = vcombine.low %v999_v7, %v1003_v9 }
 0x1ed   :  { %4516 = vrsqrt.f32 %v306_v12  ;;  %v3930_v12 = vcombine.high %v999_v7, %v1003_v9  ;;  %v1066_v9 = vld [vmem:[#allocation2 + $0x360] sm:$0xff] }
 0x1ee   :  { %4518 = vrsqrt.f32 %v307_v13  ;;  %v1006_v13 = vld [vmem:[#allocation2 + $0x180] sm:$0xff] }
 0x1f7   :  { %v4517_v20 = vpop.eup %4516 }
 0x1f8   :  { %v4519_v22 = vpop.eup %4518  ;;  %v310_v23 = vmul.f32 %v4517_v20, %v288_v57  ;;  %v3905_v57 = vcombine.low %v975_v53, %v979_v55  ;;  %v1011_v20 = vld [vmem:[#allocation2 + $0x1a8] sm:$0xff] }
 0x1f9   :  { %v311_v25 = vmul.f32 %v4519_v22, %v289_v58  ;;  %v3906_v58 = vcombine.high %v975_v53, %v979_v55  ;;  %v3937_v22 = vcombine.low %v1007_v18, %v1011_v20  ;;  %v1042_v55 = vld [vmem:[#allocation2 + $0x2a0] sm:$0xff] }
 0x1fa   :  { %v324_v27 = vmul.f32 %v317_v19, %v310_v23  ;;  %v3936_v19 = vcombine.high %v1006_v13, %v1010_v16  ;;  %v3938_v23 = vcombine.high %v1007_v18, %v1011_v20  ;;  %v1074_v20 = vld [vmem:[#allocation2 + $0x3a0] sm:$0xff] }
 0x1fb   :  { %v325_v28 = vmul.f32 %v321_v21, %v311_v25  ;;  %v3935_v21 = vcombine.low %v1006_v13, %v1010_v16  ;;  %v1018_v25 = vld [vmem:[#allocation2 + $0x1e0] sm:$0xff] }
 0x1fc   :  { %v338_v29 = vadd.f32 %v331_v24, %v324_v27  ;;  %v1014_v24 = vld [vmem:[#allocation2 + $0x1c0] sm:$0xff] }
 0x1fd   :  { %v339_v30 = vadd.f32 %v335_v26, %v325_v28  ;;  %v1015_v26 = vld [vmem:[#allocation2 + $0x1c8] sm:$0xff]  ;;  %v3944_v27 = vcombine.high %v1014_v24, %v1018_v25 }
 0x1fe   :  { %vm340_vm3 = vcmp.gt.f32.partialorder %v338_v29, 0.0  ;;  %v342_v35 = vmul.f32 0.2, %v338_v29  ;;  %v1019_v28 = vld [vmem:[#allocation2 + $0x1e8] sm:$0xff] }
 0x1ff   :  { %vm341_vm4 = vcmp.gt.f32.partialorder %v339_v30, 0.0  ;;  %v343_v38 = vmul.f32 0.2, %v339_v30 }
 0x200   :  { %v344_v40 = vsel %vm340_vm3, %v338_v29, %v342_v35  ;;  %v3943_v29 = vcombine.low %v1014_v24, %v1018_v25  ;;  %v3946_v35 = vcombine.high %v1015_v26, %v1019_v28 }
 0x201   :  { %v345_v44 = vsel %vm341_vm4, %v339_v30, %v343_v38  ;;  %v346_v46 = vpack.c.bf16 %v344_v40, %v344_v40  ;;  %v3945_v30 = vcombine.low %v1015_v26, %v1019_v28  ;;  %v1022_v38 = vld [vmem:[#allocation2 + $0x200] sm:$0xff]  ;;  %v1023_v40 = vld [vmem:[#allocation2 + $0x208] sm:$0xff] }
 0x202   :  { %v347_v45 = vpack.c.bf16 %v345_v44, %v345_v44  ;;  %v3952_v41 = vcombine.high %v1022_v38, %v1026_v39  ;;  %v3951_v43 = vcombine.low %v1022_v38, %v1026_v39  ;;  %v3953_v44 = vcombine.low %v1023_v40, %v1027_v42  ;;  %v1082_v28 = vld [vmem:[#allocation2 + $0x3e0] sm:$0xff]  ;;  %v1083_v38 = vld [vmem:[#allocation2 + $0x3e8] sm:$0xff] }
 0x204   :  { %764 = vmatprep.mubr.bf16.mxu0 %v347_v45  ;;  %805 = vmatprep.mubr.bf16.mxu1 %v347_v45  ;;  %v3954_v45 = vcombine.high %v1023_v40, %v1027_v42  ;;  %v4982_v42 = vld [vmem:[#allocation2 + $0x420] sm:$0xff] }
 0x205   :  { %765 = vmatmul.mubr.bf16.vlgmr.msra.gmra.mrb[4].mxu0 %v346_v46  ;;  %806 = vmatmul.mubr.bf16.vlgmr.msra.gmra.mrb[4].mxu1 %v346_v46  ;;  %v1030_v46 = vld [vmem:[#allocation2 + $0x240] sm:$0xff] }
 0x206   :  { %2495 = vmatpush1.bf16.msra.mxu0 %v3887_v34  ;;  %2577 = vmatpush1.bf16.msra.mxu1 %v3889_v37  ;;  %v3912_v34 = vcombine.high %v982_v31, %v986_v32  ;;  %v3911_v37 = vcombine.low %v982_v31, %v986_v32 }
 0x207   :  { %2496 = vmatprep.subr.bf16.mxu0 %v3896_v47  ;;  %2578 = vmatprep.subr.bf16.mxu1 %v3898_v48  ;;  %v1034_v47 = vld [vmem:[#allocation2 + $0x260] sm:$0xff]  ;;  %v1031_v48 = vld [vmem:[#allocation2 + $0x248] sm:$0xff] }
 0x208   :  { %v3959_v51 = vcombine.low %v1030_v46, %v1034_v47 }
 0x20a   :  { %2497 = vmatpush1.bf16.msra.mxu0 %v3895_v49  ;;  %2579 = vmatpush1.bf16.msra.mxu1 %v3897_v50  ;;  %v3960_v49 = vcombine.high %v1030_v46, %v1034_v47  ;;  %v1035_v50 = vld [vmem:[#allocation2 + $0x268] sm:$0xff] }
 0x20b   :  { %2498 = vmatprep.subr.bf16.mxu0 %v3904_v54  ;;  %2580 = vmatprep.subr.bf16.mxu1 %v3906_v58  ;;  %v3961_v52 = vcombine.low %v1031_v48, %v1035_v50  ;;  %v3962_v53 = vcombine.high %v1031_v48, %v1035_v50  ;;  %v1038_v54 = vld [vmem:[#allocation2 + $0x280] sm:$0xff]  ;;  %v1043_v58 = vld [vmem:[#allocation2 + $0x2a8] sm:$0xff] }
 0x20c   :  { %v3967_v31 = vcombine.low %v1038_v54, %v1042_v55 }
 0x20e   :  { %2499 = vmatpush1.bf16.msra.mxu0 %v3903_v56  ;;  %2581 = vmatpush1.bf16.msra.mxu1 %v3905_v57  ;;  %v1039_v56 = vld [vmem:[#allocation2 + $0x288] sm:$0xff]  ;;  %v3968_v57 = vcombine.high %v1038_v54, %v1042_v55 }
 0x20f   :  { %2500 = vmatprep.subr.bf16.mxu0 %v3912_v34  ;;  %2582 = vmatprep.subr.bf16.mxu1 %v3914_v60  ;;  %v3969_v32 = vcombine.low %v1039_v56, %v1043_v58  ;;  %v3970_v33 = vcombine.high %v1039_v56, %v1043_v58  ;;  %v1046_v34 = vld [vmem:[#allocation2 + $0x2c0] sm:$0xff]  ;;  %v1051_v60 = vld [vmem:[#allocation2 + $0x2e8] sm:$0xff] }
 0x210   :  { %v3975_v61 = vcombine.low %v1046_v34, %v1050_v36 }
 0x212   :  { %2501 = vmatpush1.bf16.msra.mxu0 %v3911_v37  ;;  %2583 = vmatpush1.bf16.msra.mxu1 %v3913_v59  ;;  %v1047_v37 = vld [vmem:[#allocation2 + $0x2c8] sm:$0xff]  ;;  %v3976_v59 = vcombine.high %v1046_v34, %v1050_v36 }
 0x213   :  { %2502 = vmatprep.subr.bf16.mxu0 %v3920_v0  ;;  %2584 = vmatprep.subr.bf16.mxu1 %v3922_v4  ;;  %v3977_v62 = vcombine.low %v1047_v37, %v1051_v60  ;;  %v3978_v63 = vcombine.high %v1047_v37, %v1051_v60  ;;  %v1054_v0 = vld [vmem:[#allocation2 + $0x300] sm:$0xff]  ;;  %v1059_v4 = vld [vmem:[#allocation2 + $0x328] sm:$0xff] }
 0x214   :  { %v3983_v5 = vcombine.low %v1054_v0, %v1058_v1 }
 0x216   :  { %2503 = vmatpush1.bf16.msra.mxu0 %v3919_v2  ;;  %2585 = vmatpush1.bf16.msra.mxu1 %v3921_v3  ;;  %v1055_v2 = vld [vmem:[#allocation2 + $0x308] sm:$0xff]  ;;  %v3984_v3 = vcombine.high %v1054_v0, %v1058_v1 }
 0x217   :  { %2504 = vmatprep.subr.bf16.mxu0 %v3928_v8  ;;  %2586 = vmatprep.subr.bf16.mxu1 %v3930_v12  ;;  %v3985_v6 = vcombine.low %v1055_v2, %v1059_v4  ;;  %v3986_v7 = vcombine.high %v1055_v2, %v1059_v4  ;;  %v1062_v8 = vld [vmem:[#allocation2 + $0x340] sm:$0xff]  ;;  %v1067_v12 = vld [vmem:[#allocation2 + $0x368] sm:$0xff] }
 0x218   :  { %v3991_v13 = vcombine.low %v1062_v8, %v1066_v9 }
 0x21a   :  { %2505 = vmatpush1.bf16.msra.mxu0 %v3927_v10  ;;  %2587 = vmatpush1.bf16.msra.mxu1 %v3929_v11  ;;  %v3992_v10 = vcombine.high %v1062_v8, %v1066_v9  ;;  %v1063_v11 = vld [vmem:[#allocation2 + $0x348] sm:$0xff] }
 0x21b   :  { %2506 = vmatprep.subr.bf16.mxu0 %v3936_v19  ;;  %2588 = vmatprep.subr.bf16.mxu1 %v3938_v23  ;;  %v3993_v16 = vcombine.low %v1063_v11, %v1067_v12  ;;  %v3994_v18 = vcombine.high %v1063_v11, %v1067_v12  ;;  %v1070_v19 = vld [vmem:[#allocation2 + $0x380] sm:$0xff]  ;;  %v1075_v23 = vld [vmem:[#allocation2 + $0x3a8] sm:$0xff] }
 0x21c   :  { %v3999_v24 = vcombine.low %v1070_v19, %v1074_v20 }
 0x21e   :  { %2507 = vmatpush1.bf16.msra.mxu0 %v3935_v21  ;;  %2589 = vmatpush1.bf16.msra.mxu1 %v3937_v22  ;;  %v1071_v21 = vld [vmem:[#allocation2 + $0x388] sm:$0xff]  ;;  %v4000_v22 = vcombine.high %v1070_v19, %v1074_v20 }
 0x21f   :  { %2508 = vmatprep.subr.bf16.mxu0 %v3944_v27  ;;  %2590 = vmatprep.subr.bf16.mxu1 %v3946_v35  ;;  %v4001_v25 = vcombine.low %v1071_v21, %v1075_v23  ;;  %v4002_v26 = vcombine.high %v1071_v21, %v1075_v23  ;;  %v1078_v27 = vld [vmem:[#allocation2 + $0x3c0] sm:$0xff] }
 0x220   :  { %v4008_v35 = vcombine.high %v1078_v27, %v1082_v28 }
 0x222   :  { %2509 = vmatpush1.bf16.msra.mxu0 %v3943_v29  ;;  %2591 = vmatpush1.bf16.msra.mxu1 %v3945_v30  ;;  %v1079_v29 = vld [vmem:[#allocation2 + $0x3c8] sm:$0xff]  ;;  %v4007_v30 = vcombine.low %v1078_v27, %v1082_v28 }
 0x223   :  { %2510 = vmatprep.subr.bf16.mxu0 %v3952_v41  ;;  %2592 = vmatprep.subr.bf16.mxu1 %v3954_v45  ;;  %v4009_v39 = vcombine.low %v1079_v29, %v1083_v38  ;;  %v4010_v40 = vcombine.high %v1079_v29, %v1083_v38  ;;  %v4980_v41 = vld [vmem:[#allocation2 + $0x400] sm:$0xff]  ;;  %v4988_v45 = vld [vmem:[#allocation2 + $0x428] sm:$0xff] }
 0x224   :  { %v4015_v46 = vcombine.low %v4980_v41, %v4982_v42 }
 0x226   :  { %2511 = vmatpush1.bf16.msra.mxu0 %v3951_v43  ;;  %2593 = vmatpush1.bf16.msra.mxu1 %v3953_v44  ;;  %v4984_v43 = vld [vmem:[#allocation2 + $0x408] sm:$0xff]  ;;  %v4016_v44 = vcombine.high %v4980_v41, %v4982_v42 }
 0x227   :  { %2512 = vmatprep.subr.bf16.mxu0 %v3960_v49  ;;  %2594 = vmatprep.subr.bf16.mxu1 %v3962_v53  ;;  %v4017_v47 = vcombine.low %v4984_v43, %v4988_v45  ;;  %v4018_v48 = vcombine.high %v4984_v43, %v4988_v45 }
 0x22a   :  { %2513 = vmatpush1.bf16.msra.mxu0 %v3959_v51  ;;  %2595 = vmatpush1.bf16.msra.mxu1 %v3961_v52 }
 0x22b   :  { %2514 = vmatprep.subr.bf16.mxu0 %v3968_v57  ;;  %2596 = vmatprep.subr.bf16.mxu1 %v3970_v33 }
 0x22e   :  { %2515 = vmatpush1.bf16.msra.mxu0 %v3967_v31  ;;  %2597 = vmatpush1.bf16.msra.mxu1 %v3969_v32 }
 0x22f   :  { %2516 = vmatprep.subr.bf16.mxu0 %v3976_v59  ;;  %2598 = vmatprep.subr.bf16.mxu1 %v3978_v63 }
 0x232   :  { %2517 = vmatpush1.bf16.msra.mxu0 %v3975_v61  ;;  %2599 = vmatpush1.bf16.msra.mxu1 %v3977_v62 }
 0x233   :  { %2518 = vmatprep.subr.bf16.mxu0 %v3984_v3  ;;  %2600 = vmatprep.subr.bf16.mxu1 %v3986_v7 }
 0x236   :  { %2519 = vmatpush1.bf16.msra.mxu0 %v3983_v5  ;;  %2601 = vmatpush1.bf16.msra.mxu1 %v3985_v6 }
 0x237   :  { %2520 = vmatprep.subr.bf16.mxu0 %v3992_v10  ;;  %2602 = vmatprep.subr.bf16.mxu1 %v3994_v18 }
 0x23a   :  { %2521 = vmatpush1.bf16.msra.mxu0 %v3991_v13  ;;  %2603 = vmatpush1.bf16.msra.mxu1 %v3993_v16 }
 0x23b   :  { %2522 = vmatprep.subr.bf16.mxu0 %v4000_v22  ;;  %2604 = vmatprep.subr.bf16.mxu1 %v4002_v26 }
 0x23e   :  { %2523 = vmatpush1.bf16.msra.mxu0 %v3999_v24  ;;  %2605 = vmatpush1.bf16.msra.mxu1 %v4001_v25 }
 0x23f   :  { %2524 = vmatprep.subr.bf16.mxu0 %v4008_v35  ;;  %2606 = vmatprep.subr.bf16.mxu1 %v4010_v40 }
 0x242   :  { %2525 = vmatpush1.bf16.msra.mxu0 %v4007_v30  ;;  %2607 = vmatpush1.bf16.msra.mxu1 %v4009_v39 }
 0x243   :  { %2535 = vmatprep.subr.bf16.mxu0 %v4016_v44  ;;  %2617 = vmatprep.subr.bf16.mxu1 %v4018_v48 }
 0x2d8   :  { %v766_v49 = vpop.f32.mrb[4].mxu0  ;;  %v807_v50 = vpop.f32.mrb[4].mxu1 }
 0x2d9   :  { %v814_v51 = vrot.slane %v766_v49, 4  ;;  %v826_v52 = vrot.slane %v807_v50, 4  ;;  %v768_v53 = vpop.f32.mrb[5].mxu0  ;;  %v809_v54 = vpop.f32.mrb[5].mxu1 }
 0x2da   :  { %v820_v55 = vrot.slane %v768_v53, 4  ;;  %v832_v56 = vrot.slane %v809_v54, 4  ;;  %v770_v57 = vpop.f32.mrb[6].mxu0  ;;  %v811_v58 = vpop.f32.mrb[6].mxu1 }
 0x2db   :  { %v815_v31 = vadd.f32 %v814_v51, %v766_v49  ;;  %v827_v32 = vadd.f32 %v826_v52, %v807_v50  ;;  %v771_v33 = vpop.f32.mrb[7].mxu0  ;;  %v812_v34 = vpop.f32.mrb[7].mxu1 }
 0x2dc   :  { %v821_v36 = vadd.f32 %v820_v55, %v768_v53  ;;  %v833_v37 = vadd.f32 %v832_v56, %v809_v54 }
 0x2dd   :  { %v816_v59 = vrot.slane %v815_v31, 2  ;;  %v828_v60 = vrot.slane %v827_v32, 2 }
 0x2de   :  { %v822_v61 = vrot.slane %v821_v36, 2  ;;  %v834_v62 = vrot.slane %v833_v37, 2 }
 0x2df   :  { %v817_v63 = vadd.f32 %v816_v59, %v815_v31  ;;  %v829_v0 = vadd.f32 %v828_v60, %v827_v32 }
 0x2e0   :  { %v823_v1 = vadd.f32 %v822_v61, %v821_v36  ;;  %v835_v2 = vadd.f32 %v834_v62, %v833_v37 }
 0x2e1   :  { %v818_v3 = vrot.slane %v817_v63, 1  ;;  %v830_v4 = vrot.slane %v829_v0, 1 }
 0x2e2   :  { %v824_v5 = vrot.slane %v823_v1, 1  ;;  %v836_v6 = vrot.slane %v835_v2, 1 }
 0x2e3   :  { %v819_v7 = vadd.f32 %v818_v3, %v817_v63  ;;  %v831_v8 = vadd.f32 %v830_v4, %v829_v0  ;;  %v890_v0 = vld [vmem:[%s5308_s7] sm:$0xf]  ;;  %v5006_v3 = vsub.s32 3, %v4956_v14 }
 0x2e4   :  { %v825_v9 = vadd.f32 %v824_v5, %v823_v1  ;;  %v837_v10 = vadd.f32 %v836_v6, %v835_v2  ;;  %v5000_v1 = vsub.s32 2, %v4956_v14  ;;  %v916_v2 = vld [vmem:[%s5309_s8] sm:$0xf]  ;;  %v895_v4 = vrot.slane %v890_v0, %v4959_v15 }
 0x2e5   :  { %v838_v11 = vmul.f32 0.125, %v819_v7  ;;  %v840_v12 = vmul.f32 0.125, %v831_v8 }
 0x2e6   :  { %v839_v13 = vmul.f32 0.125, %v825_v9  ;;  %v841_v16 = vmul.f32 0.125, %v837_v10  ;;  %v903_v6 = vrot.slane %v890_v0, %v5000_v1  ;;  %v921_v9 = vrot.slane %v916_v2, %v4959_v15 }
 0x2e7   :  { %v842_v18 = vsub.f32 %v766_v49, %v838_v11  ;;  %v844_v19 = vsub.f32 %v807_v50, %v840_v12  ;;  %v899_v10 = vrot.slane %v890_v0, %v4965_v17 }
 0x2e8   :  { %v843_v20 = vsub.f32 %v768_v53, %v839_v13  ;;  %v845_v21 = vsub.f32 %v809_v54, %v841_v16  ;;  %v929_v13 = vrot.slane %v916_v2, %v5000_v1  ;;  %v907_v16 = vrot.slane %v890_v0, %v5006_v3  ;;  %v1119_v0 = vld [vmem:[#allocation2 + $0x508] sm:$0xff] }
 0x2e9   :  { %v846_v22 = vmul.f32 %v842_v18, %v842_v18  ;;  %v848_v23 = vmul.f32 %v844_v19, %v844_v19 }
 0x2ea   :  { %v847_v24 = vmul.f32 %v843_v20, %v843_v20  ;;  %v849_v25 = vmul.f32 %v845_v21, %v845_v21 }
 0x2eb   :  { %v850_v26 = vrot.slane %v846_v22, 4  ;;  %v862_v27 = vrot.slane %v848_v23, 4 }
 0x2ec   :  { %v856_v28 = vrot.slane %v847_v24, 4  ;;  %v868_v29 = vrot.slane %v849_v25, 4 }
 0x2ed   :  { %v851_v30 = vadd.f32 %v850_v26, %v846_v22  ;;  %v863_v35 = vadd.f32 %v862_v27, %v848_v23 }
 0x2ee   :  { %v857_v38 = vadd.f32 %v856_v28, %v847_v24  ;;  %v869_v39 = vadd.f32 %v868_v29, %v849_v25  ;;  %v925_v25 = vrot.slane %v916_v2, %v4965_v17  ;;  %v933_v28 = vrot.slane %v916_v2, %v5006_v3  ;;  %v1123_v2 = vld [vmem:[#allocation2 + $0x528] sm:$0xff] }
 0x2ef   :  { %v852_v40 = vrot.slane %v851_v30, 2  ;;  %v864_v44 = vrot.slane %v863_v35, 2 }
 0x2f0   :  { %v858_v48 = vrot.slane %v857_v38, 2  ;;  %v870_v51 = vrot.slane %v869_v39, 2 }
 0x2f1   :  { %v853_v49 = vadd.f32 %v852_v40, %v851_v30  ;;  %v865_v50 = vadd.f32 %v864_v44, %v863_v35 }
 0x2f2   :  { %v859_v52 = vadd.f32 %v858_v48, %v857_v38  ;;  %v871_v53 = vadd.f32 %v870_v51, %v869_v39  ;;  %v1094_v48 = vld [vmem:[#allocation2 + $0x440] sm:$0xff] }
 0x2f3   :  { %v854_v54 = vrot.slane %v853_v49, 1  ;;  %v866_v55 = vrot.slane %v865_v50, 1 }
 0x2f4   :  { %v860_v56 = vrot.slane %v859_v52, 1  ;;  %v872_v57 = vrot.slane %v871_v53, 1 }
 0x2f5   :  { %v855_v58 = vadd.f32 %v854_v54, %v853_v49  ;;  %v867_v31 = vadd.f32 %v866_v55, %v865_v50  ;;  %v1098_v49 = vld [vmem:[#allocation2 + $0x460] sm:$0xff]  ;;  %v1099_v50 = vld [vmem:[#allocation2 + $0x468] sm:$0xff] }
 0x2f6   :  { %v861_v32 = vadd.f32 %v860_v56, %v859_v52  ;;  %v873_v33 = vadd.f32 %v872_v57, %v871_v53  ;;  %v1102_v55 = vld [vmem:[#allocation2 + $0x480] sm:$0xff]  ;;  %v4024_v56 = vcombine.high %v1094_v48, %v1098_v49 }
 0x2f7   :  { %v874_v34 = vmul.f32 0.125, %v855_v58  ;;  %v876_v36 = vmul.f32 0.125, %v867_v31  ;;  %v1106_v58 = vld [vmem:[#allocation2 + $0x4a0] sm:$0xff]  ;;  %v1103_v31 = vld [vmem:[#allocation2 + $0x488] sm:$0xff] }
 0x2f8   :  { %v875_v37 = vmul.f32 0.125, %v861_v32  ;;  %v877_v59 = vmul.f32 0.125, %v873_v33  ;;  %v1107_v32 = vld [vmem:[#allocation2 + $0x4a8] sm:$0xff]  ;;  %v4031_v41 = vcombine.low %v1102_v55, %v1106_v58 }
 0x2f9   :  { %v878_v60 = vadd.f32 0.8, %v874_v34  ;;  %v880_v61 = vadd.f32 0.8, %v876_v36  ;;  %v4023_v34 = vcombine.low %v1094_v48, %v1098_v49  ;;  %v4033_v42 = vcombine.low %v1103_v31, %v1107_v32  ;;  %v1154_v49 = vld [vmem:[#allocation2 + $0x620] sm:$0xff] }
 0x2fa   :  { %v879_v62 = vadd.f32 0.8, %v875_v37  ;;  %v881_v63 = vadd.f32 0.8, %v877_v59  ;;  %v4032_v37 = vcombine.high %v1102_v55, %v1106_v58  ;;  %v4034_v59 = vcombine.high %v1103_v31, %v1107_v32  ;;  %v1158_v58 = vld [vmem:[#allocation2 + $0x640] sm:$0xff]  ;;  %v1159_v32 = vld [vmem:[#allocation2 + $0x648] sm:$0xff] }
 0x2fb   :  { %4520 = vrsqrt.f32 %v878_v60  ;;  %v1110_v60 = vld [vmem:[#allocation2 + $0x4c0] sm:$0xff] }
 0x2fc   :  { %4522 = vrsqrt.f32 %v880_v61  ;;  %v1114_v61 = vld [vmem:[#allocation2 + $0x4e0] sm:$0xff] }
 0x2fd   :  { %4524 = vrsqrt.f32 %v879_v62  ;;  %v1111_v62 = vld [vmem:[#allocation2 + $0x4c8] sm:$0xff]  ;;  %v4040_v43 = vcombine.high %v1110_v60, %v1114_v61  ;;  %v1162_v31 = vld [vmem:[#allocation2 + $0x660] sm:$0xff] }
 0x2fe   :  { %4526 = vrsqrt.f32 %v881_v63  ;;  %v1115_v63 = vld [vmem:[#allocation2 + $0x4e8] sm:$0xff] }
 0x2ff   :  { %v4042_v45 = vcombine.high %v1111_v62, %v1115_v63 }
 0x305   :  { %v4521_v5 = vpop.eup %4520 }
 0x306   :  { %v4523_v7 = vpop.eup %4522  ;;  %v886_v8 = vmul.f32 %v4521_v5, %v842_v18  ;;  %v4041_v5 = vcombine.low %v1111_v62, %v1115_v63  ;;  %v1170_v62 = vld [vmem:[#allocation2 + $0x6a0] sm:$0xff]  ;;  %v1167_v63 = vld [vmem:[#allocation2 + $0x688] sm:$0xff] }
 0x307   :  { %v4525_v11 = vpop.eup %4524  ;;  %v888_v12 = vmul.f32 %v4523_v7, %v844_v19  ;;  %v4050_v7 = vcombine.high %v1119_v0, %v1123_v2 }
 0x308   :  { %v4527_v22 = vpop.eup %4526  ;;  %v912_v23 = vmul.f32 %v895_v4, %v886_v8  ;;  %v887_v24 = vmul.f32 %v4525_v11, %v843_v20  ;;  %v4039_v4 = vcombine.low %v1110_v60, %v1114_v61  ;;  %v1126_v8 = vld [vmem:[#allocation2 + $0x540] sm:$0xff]  ;;  %v1131_v11 = vld [vmem:[#allocation2 + $0x568] sm:$0xff] }
 0x309   :  { %v914_v26 = vmul.f32 %v903_v6, %v888_v12  ;;  %v889_v27 = vmul.f32 %v4527_v22, %v845_v21  ;;  %v1095_v21 = vld [vmem:[#allocation2 + $0x448] sm:$0xff]  ;;  %v1166_v61 = vld [vmem:[#allocation2 + $0x680] sm:$0xff] }
 0x30a   :  { %v938_v18 = vadd.f32 %v921_v9, %v912_v23  ;;  %v913_v29 = vmul.f32 %v899_v10, %v887_v24  ;;  %v4026_v57 = vcombine.high %v1095_v21, %v1099_v50  ;;  %v4025_v36 = vcombine.low %v1095_v21, %v1099_v50  ;;  %v1130_v9 = vld [vmem:[#allocation2 + $0x560] sm:$0xff]  ;;  %v1127_v10 = vld [vmem:[#allocation2 + $0x548] sm:$0xff] }
 0x30b   :  { %v5016_v30 = vadd.f32 %v929_v13, %v914_v26  ;;  %v915_v35 = vmul.f32 %v907_v16, %v889_v27  ;;  %v4049_v13 = vcombine.low %v1119_v0, %v1123_v2  ;;  %v4056_v16 = vcombine.high %v1126_v8, %v1130_v9  ;;  %v1134_v23 = vld [vmem:[#allocation2 + $0x580] sm:$0xff]  ;;  %v1139_v26 = vld [vmem:[#allocation2 + $0x5a8] sm:$0xff] }
 0x30c   :  { %v939_v38 = vadd.f32 %v925_v25, %v913_v29  ;;  %vm942_vm5 = vcmp.gt.f32.partialorder %v938_v18, 0.0  ;;  %v946_v19 = vmul.f32 0.2, %v938_v18  ;;  %v4058_v22 = vcombine.high %v1127_v10, %v1131_v11  ;;  %v1138_v24 = vld [vmem:[#allocation2 + $0x5a0] sm:$0xff]  ;;  %v1135_v25 = vld [vmem:[#allocation2 + $0x588] sm:$0xff] }
 0x30d   :  { %v941_v39 = vadd.f32 %v933_v28, %v915_v35  ;;  %v4055_v27 = vcombine.low %v1126_v8, %v1130_v9  ;;  %v4057_v28 = vcombine.low %v1127_v10, %v1131_v11  ;;  %v4066_v29 = vcombine.high %v1135_v25, %v1139_v26  ;;  %v1142_v35 = vld [vmem:[#allocation2 + $0x5c0] sm:$0xff]  ;;  %v1151_v21 = vld [vmem:[#allocation2 + $0x608] sm:$0xff] }
 0x30e   :  { %vm943_vm6 = vcmp.gt.f32.partialorder %v939_v38, 0.0  ;;  %v947_v40 = vmul.f32 0.2, %v939_v38  ;;  %v950_v44 = vsel %vm942_vm5, %v938_v18, %v946_v19  ;;  %v4064_v18 = vcombine.high %v1134_v23, %v1138_v24  ;;  %v1143_v19 = vld [vmem:[#allocation2 + $0x5c8] sm:$0xff]  ;;  %v1178_v0 = vld [vmem:[#allocation2 + $0x6e0] sm:$0xff] }
 0x30f   :  { %vm945_vm7 = vcmp.gt.f32.partialorder %v941_v39, 0.0  ;;  %v949_v20 = vmul.f32 0.2, %v941_v39  ;;  %v5020_v54 = vpack.c.bf16 %v950_v44, %v950_v44  ;;  %v4065_v44 = vcombine.low %v1135_v25, %v1139_v26  ;;  %v1155_v50 = vld [vmem:[#allocation2 + $0x628] sm:$0xff]  ;;  %v1182_v9 = vld [vmem:[#allocation2 + $0x700] sm:$0xff] }
 0x310   :  { %v951_v51 = vsel %vm943_vm6, %v939_v38, %v947_v40  ;;  %v1146_v38 = vld [vmem:[#allocation2 + $0x5e0] sm:$0xff]  ;;  %v4063_v40 = vcombine.low %v1134_v23, %v1138_v24  ;;  %v1175_v2 = vld [vmem:[#allocation2 + $0x6c8] sm:$0xff]  ;;  %vm944_vm8 = vcmp.gt.f32.partialorder %v5016_v30, 0.0 }
 0x311   :  { %v5018_v52 = vpack.c.bf16 %v951_v51, %v951_v51  ;;  %v953_v53 = vsel %vm945_vm7, %v941_v39, %v949_v20  ;;  %v1147_v39 = vld [vmem:[#allocation2 + $0x5e8] sm:$0xff]  ;;  %v4072_v20 = vcombine.high %v1142_v35, %v1146_v38  ;;  %v1150_v51 = vld [vmem:[#allocation2 + $0x600] sm:$0xff] }
 0x312   :  { %v5026_v33 = vpack.c.bf16 %v953_v53, %v953_v53  ;;  %v4074_v48 = vcombine.high %v1143_v19, %v1147_v39  ;;  %v4071_v53 = vcombine.low %v1142_v35, %v1146_v38  ;;  %v4073_v55 = vcombine.low %v1143_v19, %v1147_v39  ;;  %v1186_v10 = vld [vmem:[#allocation2 + $0x720] sm:$0xff]  ;;  %v1183_v11 = vld [vmem:[#allocation2 + $0x708] sm:$0xff] }
 0x313   :  { %2526 = vmatprep.mubr.bf16.mxu0 %v5018_v52  ;;  %2608 = vmatprep.mubr.bf16.mxu1 %v5018_v52  ;;  %v1190_v24 = vld [vmem:[#allocation2 + $0x740] sm:$0xff]  ;;  %v1191_v26 = vld [vmem:[#allocation2 + $0x748] sm:$0xff] }
 0x314   :  { %2527 = vmatmul.mubr.bf16.vlgmr.msra.gmra.mrb[8].mxu0 %v5020_v54  ;;  %2609 = vmatmul.mubr.bf16.vlgmr.msra.gmra.mrb[8].mxu1 %v5020_v54  ;;  %v1194_v25 = vld [vmem:[#allocation2 + $0x760] sm:$0xff]  ;;  %v1199_v39 = vld [vmem:[#allocation2 + $0x788] sm:$0xff] }
 0x315   :  { %2536 = vmatpush1.bf16.msra.mxu0 %v4015_v46  ;;  %2618 = vmatpush1.bf16.msra.mxu1 %v4017_v47  ;;  %v1118_v46 = vld [vmem:[#allocation2 + $0x500] sm:$0xff] }
 0x316   :  { %2567 = vmatprep.mubr.bf16.mxu0 %v5026_v33  ;;  %2649 = vmatprep.mubr.bf16.mxu1 %v5026_v33  ;;  %v1122_v47 = vld [vmem:[#allocation2 + $0x520] sm:$0xff] }
 0x317   :  { %2537 = vmatprep.subr.bf16.mxu0 %v4024_v56  ;;  %2619 = vmatprep.subr.bf16.mxu1 %v4026_v57  ;;  %v4048_v6 = vcombine.high %v1118_v46, %v1122_v47  ;;  %v4047_v12 = vcombine.low %v1118_v46, %v1122_v47  ;;  %v4080_v56 = vcombine.high %v1150_v51, %v1154_v49  ;;  %v1174_v47 = vld [vmem:[#allocation2 + $0x6c0] sm:$0xff] }
 0x318   :  { %v4082_v57 = vcombine.high %v1151_v21, %v1155_v50  ;;  %v1198_v38 = vld [vmem:[#allocation2 + $0x780] sm:$0xff] }
 0x319   :  { %2538 = vmatpush1.bf16.msra.mxu0 %v4023_v34  ;;  %2620 = vmatpush1.bf16.msra.mxu1 %v4025_v36  ;;  %v1163_v34 = vld [vmem:[#allocation2 + $0x668] sm:$0xff]  ;;  %v4079_v36 = vcombine.low %v1150_v51, %v1154_v49  ;;  %v1202_v19 = vld [vmem:[#allocation2 + $0x7a0] sm:$0xff] }
 0x31a   :  { %2539 = vmatprep.subr.bf16.mxu0 %v4032_v37  ;;  %2621 = vmatprep.subr.bf16.mxu1 %v4034_v59  ;;  %v4081_v37 = vcombine.low %v1151_v21, %v1155_v50  ;;  %v4088_v59 = vcombine.high %v1158_v58, %v1162_v31  ;;  %v4090_v60 = vcombine.high %v1159_v32, %v1163_v34  ;;  %v1206_v49 = vld [vmem:[#allocation2 + $0x7c0] sm:$0xff]  ;;  %v1207_v50 = vld [vmem:[#allocation2 + $0x7c8] sm:$0xff] }
 0x31b   :  { %v1210_v21 = vld [vmem:[#allocation2 + $0x7e0] sm:$0xff] }
 0x31d   :  { %2540 = vmatpush1.bf16.msra.mxu0 %v4031_v41  ;;  %2622 = vmatpush1.bf16.msra.mxu1 %v4033_v42  ;;  %v1171_v41 = vld [vmem:[#allocation2 + $0x6a8] sm:$0xff]  ;;  %v4087_v42 = vcombine.low %v1158_v58, %v1162_v31  ;;  %v960_v31 = vld [vmem:[#allocation2 + $0x10] sm:$0xff] }
 0x31e   :  { %2541 = vmatprep.subr.bf16.mxu0 %v4040_v43  ;;  %2623 = vmatprep.subr.bf16.mxu1 %v4042_v45  ;;  %v4089_v43 = vcombine.low %v1159_v32, %v1163_v34  ;;  %v4096_v45 = vcombine.high %v1166_v61, %v1170_v62  ;;  %v4098_v46 = vcombine.high %v1167_v63, %v1171_v41  ;;  %v948_v32 = vmul.f32 0.2, %v5016_v30  ;;  %v964_v34 = vld [vmem:[#allocation2 + $0x30] sm:$0xff] }
 0x321   :  { %2542 = vmatpush1.bf16.msra.mxu0 %v4039_v4  ;;  %2624 = vmatpush1.bf16.msra.mxu1 %v4041_v5  ;;  %v1179_v4 = vld [vmem:[#allocation2 + $0x6e8] sm:$0xff]  ;;  %v4095_v5 = vcombine.low %v1166_v61, %v1170_v62  ;;  %v3892_v61 = vcombine.high %v960_v31, %v964_v34 }
 0x322   :  { %2543 = vmatprep.subr.bf16.mxu0 %v4048_v6  ;;  %2625 = vmatprep.subr.bf16.mxu1 %v4050_v7  ;;  %v4097_v6 = vcombine.low %v1167_v63, %v1171_v41  ;;  %v4104_v7 = vcombine.high %v1174_v47, %v1178_v0  ;;  %v4106_v8 = vcombine.high %v1175_v2, %v1179_v4  ;;  %v968_v41 = vld [vmem:[#allocation2 + $0x50] sm:$0xff] }
 0x323   :  { %v952_v63 = vsel %vm944_vm8, %v5016_v30, %v948_v32  ;;  %v977_v30 = vld [vmem:[#allocation2 + $0x98] sm:$0xff] }
 0x325   :  { %2544 = vmatpush1.bf16.msra.mxu0 %v4047_v12  ;;  %2626 = vmatpush1.bf16.msra.mxu1 %v4049_v13  ;;  %v1187_v12 = vld [vmem:[#allocation2 + $0x728] sm:$0xff]  ;;  %v4103_v13 = vcombine.low %v1174_v47, %v1178_v0  ;;  %v5039_v47 = vpack.c.bf16 %v952_v63, %v952_v63 }
 0x326   :  { %2545 = vmatprep.subr.bf16.mxu0 %v4056_v16  ;;  %2627 = vmatprep.subr.bf16.mxu1 %v4058_v22  ;;  %v4105_v16 = vcombine.low %v1175_v2, %v1179_v4  ;;  %v4112_v22 = vcombine.high %v1182_v9, %v1186_v10  ;;  %v4114_v23 = vcombine.high %v1183_v11, %v1187_v12 }
 0x329   :  { %2546 = vmatpush1.bf16.msra.mxu0 %v4055_v27  ;;  %2628 = vmatpush1.bf16.msra.mxu1 %v4057_v28  ;;  %v1195_v27 = vld [vmem:[#allocation2 + $0x768] sm:$0xff]  ;;  %v4111_v28 = vcombine.low %v1182_v9, %v1186_v10 }
 0x32a   :  { %2547 = vmatprep.subr.bf16.mxu0 %v4064_v18  ;;  %2629 = vmatprep.subr.bf16.mxu1 %v4066_v29  ;;  %v4113_v18 = vcombine.low %v1183_v11, %v1187_v12  ;;  %v4120_v29 = vcombine.high %v1190_v24, %v1194_v25  ;;  %v4122_v35 = vcombine.high %v1191_v26, %v1195_v27  ;;  %v984_v12 = vld [vmem:[#allocation2 + $0xd0] sm:$0xff] }
 0x32d   :  { %2548 = vmatpush1.bf16.msra.mxu0 %v4063_v40  ;;  %2630 = vmatpush1.bf16.msra.mxu1 %v4065_v44  ;;  %v1203_v40 = vld [vmem:[#allocation2 + $0x7a8] sm:$0xff]  ;;  %v4119_v44 = vcombine.low %v1190_v24, %v1194_v25 }
 0x32e   :  { %2549 = vmatprep.subr.bf16.mxu0 %v4072_v20  ;;  %2631 = vmatprep.subr.bf16.mxu1 %v4074_v48  ;;  %v4121_v20 = vcombine.low %v1191_v26, %v1195_v27  ;;  %v4128_v48 = vcombine.high %v1198_v38, %v1202_v19  ;;  %v4130_v51 = vcombine.high %v1199_v39, %v1203_v40  ;;  %v992_v27 = vld [vmem:[#allocation2 + $0x110] sm:$0xff] }
 0x331   :  { %2550 = vmatpush1.bf16.msra.mxu0 %v4071_v53  ;;  %2632 = vmatpush1.bf16.msra.mxu1 %v4073_v55  ;;  %v1211_v53 = vld [vmem:[#allocation2 + $0x7e8] sm:$0xff]  ;;  %v4127_v55 = vcombine.low %v1198_v38, %v1202_v19 }
 0x332   :  { %2551 = vmatprep.subr.bf16.mxu0 %v4080_v56  ;;  %2633 = vmatprep.subr.bf16.mxu1 %v4082_v57  ;;  %v4129_v56 = vcombine.low %v1199_v39, %v1203_v40  ;;  %v4136_v57 = vcombine.high %v1206_v49, %v1210_v21  ;;  %v4138_v58 = vcombine.high %v1207_v50, %v1211_v53  ;;  %v1000_v39 = vld [vmem:[#allocation2 + $0x150] sm:$0xff] }
 0x333   :  { %v1004_v40 = vld [vmem:[#allocation2 + $0x170] sm:$0xff] }
 0x335   :  { %2552 = vmatpush1.bf16.msra.mxu0 %v4079_v36  ;;  %2634 = vmatpush1.bf16.msra.mxu1 %v4081_v37  ;;  %v961_v36 = vld [vmem:[#allocation2 + $0x18] sm:$0xff] }
 0x336   :  { %2553 = vmatprep.subr.bf16.mxu0 %v4088_v59  ;;  %2635 = vmatprep.subr.bf16.mxu1 %v4090_v60  ;;  %v965_v37 = vld [vmem:[#allocation2 + $0x38] sm:$0xff]  ;;  %v4135_v59 = vcombine.low %v1206_v49, %v1210_v21  ;;  %v4137_v60 = vcombine.low %v1207_v50, %v1211_v53  ;;  %v3932_v49 = vcombine.high %v1000_v39, %v1004_v40  ;;  %v1008_v50 = vld [vmem:[#allocation2 + $0x190] sm:$0xff] }
 0x337   :  { %v3894_v62 = vcombine.high %v961_v36, %v965_v37  ;;  %v3893_v0 = vcombine.low %v961_v36, %v965_v37  ;;  %v1012_v53 = vld [vmem:[#allocation2 + $0x1b0] sm:$0xff]  ;;  %v1017_v37 = vld [vmem:[#allocation2 + $0x1d8] sm:$0xff] }
 0x338   :  { %v1020_v36 = vld [vmem:[#allocation2 + $0x1f0] sm:$0xff] }
 0x339   :  { %2554 = vmatpush1.bf16.msra.mxu0 %v4087_v42  ;;  %2636 = vmatpush1.bf16.msra.mxu1 %v4089_v43  ;;  %v972_v42 = vld [vmem:[#allocation2 + $0x70] sm:$0xff]  ;;  %v969_v43 = vld [vmem:[#allocation2 + $0x58] sm:$0xff] }
 0x33a   :  { %2555 = vmatprep.subr.bf16.mxu0 %v4096_v45  ;;  %2637 = vmatprep.subr.bf16.mxu1 %v4098_v46  ;;  %v973_v45 = vld [vmem:[#allocation2 + $0x78] sm:$0xff]  ;;  %v3891_v46 = vcombine.low %v960_v31, %v964_v34  ;;  %v3900_v2 = vcombine.high %v968_v41, %v972_v42  ;;  %v3940_v31 = vcombine.high %v1008_v50, %v1012_v53  ;;  %v1016_v34 = vld [vmem:[#allocation2 + $0x1d0] sm:$0xff] }
 0x33b   :  { %v3902_v4 = vcombine.high %v969_v43, %v973_v45  ;;  %v3901_v9 = vcombine.low %v969_v43, %v973_v45  ;;  %v1025_v43 = vld [vmem:[#allocation2 + $0x218] sm:$0xff] }
 0x33c   :  { %v1029_v45 = vld [vmem:[#allocation2 + $0x238] sm:$0xff] }
 0x33d   :  { %2556 = vmatpush1.bf16.msra.mxu0 %v4095_v5  ;;  %2638 = vmatpush1.bf16.msra.mxu1 %v4097_v6  ;;  %v976_v5 = vld [vmem:[#allocation2 + $0x90] sm:$0xff] }
 0x33e   :  { %2557 = vmatprep.subr.bf16.mxu0 %v4104_v7  ;;  %2639 = vmatprep.subr.bf16.mxu1 %v4106_v8  ;;  %v980_v6 = vld [vmem:[#allocation2 + $0xb0] sm:$0xff]  ;;  %v981_v7 = vld [vmem:[#allocation2 + $0xb8] sm:$0xff]  ;;  %v3899_v8 = vcombine.low %v968_v41, %v972_v42 }
 0x33f   :  { %v3908_v10 = vcombine.high %v976_v5, %v980_v6  ;;  %v3910_v11 = vcombine.high %v977_v30, %v981_v7  ;;  %v3909_v24 = vcombine.low %v977_v30, %v981_v7  ;;  %v1024_v41 = vld [vmem:[#allocation2 + $0x210] sm:$0xff]  ;;  %v1033_v30 = vld [vmem:[#allocation2 + $0x258] sm:$0xff] }
 0x340   :  { %v1028_v42 = vld [vmem:[#allocation2 + $0x230] sm:$0xff]  ;;  %v1037_v7 = vld [vmem:[#allocation2 + $0x278] sm:$0xff] }
 0x341   :  { %2558 = vmatpush1.bf16.msra.mxu0 %v4103_v13  ;;  %2640 = vmatpush1.bf16.msra.mxu1 %v4105_v16  ;;  %v988_v13 = vld [vmem:[#allocation2 + $0xf0] sm:$0xff]  ;;  %v985_v16 = vld [vmem:[#allocation2 + $0xd8] sm:$0xff] }
 0x342   :  { %2559 = vmatprep.subr.bf16.mxu0 %v4112_v22  ;;  %2641 = vmatprep.subr.bf16.mxu1 %v4114_v23  ;;  %v989_v22 = vld [vmem:[#allocation2 + $0xf8] sm:$0xff]  ;;  %v3907_v23 = vcombine.low %v976_v5, %v980_v6  ;;  %v3916_v25 = vcombine.high %v984_v12, %v988_v13  ;;  %v1032_v5 = vld [vmem:[#allocation2 + $0x250] sm:$0xff] }
 0x343   :  { %v3918_v26 = vcombine.high %v985_v16, %v989_v22  ;;  %v1036_v6 = vld [vmem:[#allocation2 + $0x270] sm:$0xff] }
 0x345   :  { %2560 = vmatpush1.bf16.msra.mxu0 %v4111_v28  ;;  %2642 = vmatpush1.bf16.msra.mxu1 %v4113_v18  ;;  %v996_v28 = vld [vmem:[#allocation2 + $0x130] sm:$0xff]  ;;  %v997_v18 = vld [vmem:[#allocation2 + $0x138] sm:$0xff] }
 0x346   :  { %2561 = vmatprep.subr.bf16.mxu0 %v4120_v29  ;;  %2643 = vmatprep.subr.bf16.mxu1 %v4122_v35  ;;  %v3915_v29 = vcombine.low %v984_v12, %v988_v13  ;;  %v3917_v35 = vcombine.low %v985_v16, %v989_v22  ;;  %v3924_v38 = vcombine.high %v992_v27, %v996_v28  ;;  %v1040_v12 = vld [vmem:[#allocation2 + $0x290] sm:$0xff]  ;;  %v1041_v16 = vld [vmem:[#allocation2 + $0x298] sm:$0xff] }
 0x347   :  { %v1044_v13 = vld [vmem:[#allocation2 + $0x2b0] sm:$0xff]  ;;  %v1045_v22 = vld [vmem:[#allocation2 + $0x2b8] sm:$0xff] }
 0x349   :  { %2562 = vmatpush1.bf16.msra.mxu0 %v4119_v44  ;;  %2644 = vmatpush1.bf16.msra.mxu1 %v4121_v20  ;;  %v1001_v44 = vld [vmem:[#allocation2 + $0x158] sm:$0xff] }
 0x34a   :  { %2563 = vmatprep.subr.bf16.mxu0 %v4128_v48  ;;  %2645 = vmatprep.subr.bf16.mxu1 %v4130_v51  ;;  %v1005_v20 = vld [vmem:[#allocation2 + $0x178] sm:$0xff]  ;;  %v3923_v48 = vcombine.low %v992_v27, %v996_v28  ;;  %v1048_v27 = vld [vmem:[#allocation2 + $0x2d0] sm:$0xff] }
 0x34b   :  { %v3934_v21 = vcombine.high %v1001_v44, %v1005_v20  ;;  %v1052_v28 = vld [vmem:[#allocation2 + $0x2f0] sm:$0xff] }
 0x34d   :  { %2564 = vmatpush1.bf16.msra.mxu0 %v4127_v55  ;;  %2646 = vmatpush1.bf16.msra.mxu1 %v4129_v56  ;;  %v1009_v55 = vld [vmem:[#allocation2 + $0x198] sm:$0xff] }
 0x34e   :  { %2565 = vmatprep.subr.bf16.mxu0 %v4136_v57  ;;  %2647 = vmatprep.subr.bf16.mxu1 %v4138_v58  ;;  %v1013_v56 = vld [vmem:[#allocation2 + $0x1b8] sm:$0xff]  ;;  %v3931_v57 = vcombine.low %v1000_v39, %v1004_v40  ;;  %v3933_v58 = vcombine.low %v1001_v44, %v1005_v20  ;;  %v1056_v39 = vld [vmem:[#allocation2 + $0x310] sm:$0xff] }
 0x34f   :  { %v3942_v32 = vcombine.high %v1009_v55, %v1013_v56  ;;  %v1060_v40 = vld [vmem:[#allocation2 + $0x330] sm:$0xff]  ;;  %v1057_v44 = vld [vmem:[#allocation2 + $0x318] sm:$0xff] }
 0x350   :  { %v1061_v20 = vld [vmem:[#allocation2 + $0x338] sm:$0xff] }
 0x351   :  { %2566 = vmatpush1.bf16.msra.mxu0 %v4135_v59  ;;  %2648 = vmatpush1.bf16.msra.mxu1 %v4137_v60  ;;  %v1021_v59 = vld [vmem:[#allocation2 + $0x1f8] sm:$0xff]  ;;  %v3939_v60 = vcombine.low %v1008_v50, %v1012_v53  ;;  %v1064_v50 = vld [vmem:[#allocation2 + $0x350] sm:$0xff] }
 0x352   :  { %2658 = vmatprep.subr.bf16.mxu0 %v3892_v61  ;;  %2740 = vmatprep.subr.bf16.mxu1 %v3894_v62  ;;  %v3941_v61 = vcombine.low %v1009_v55, %v1013_v56  ;;  %v3948_v62 = vcombine.high %v1016_v34, %v1020_v36  ;;  %v3950_v63 = vcombine.high %v1017_v37, %v1021_v59  ;;  %v1068_v53 = vld [vmem:[#allocation2 + $0x370] sm:$0xff]  ;;  %v1065_v55 = vld [vmem:[#allocation2 + $0x358] sm:$0xff] }
 0x353   :  { %v1069_v56 = vld [vmem:[#allocation2 + $0x378] sm:$0xff] }
 0x354   :  { %2568 = vmatmul.mubr.bf16.vlgmr.msra.gmra.mrb[8].mxu0 %v5039_v47  ;;  %2650 = vmatmul.mubr.bf16.vlgmr.msra.gmra.mrb[8].mxu1 %v5039_v47 }
 0x355   :  { %2659 = vmatpush1.bf16.msra.mxu0 %v3891_v46  ;;  %2690 = vmatprep.mubr.bf16.mxu0 %v5018_v52  ;;  %v3947_v46 = vcombine.low %v1016_v34, %v1020_v36  ;;  %v1072_v34 = vld [vmem:[#allocation2 + $0x390] sm:$0xff] }
 0x356   :  { %2741 = vmatpush1.bf16.msra.mxu1 %v3893_v0  ;;  %2772 = vmatprep.mubr.bf16.mxu1 %v5018_v52  ;;  %v993_v52 = vld [vmem:[#allocation2 + $0x118] sm:$0xff]  ;;  %v3949_v0 = vcombine.low %v1017_v37, %v1021_v59  ;;  %v1076_v36 = vld [vmem:[#allocation2 + $0x3b0] sm:$0xff] }
 0x357   :  { %2660 = vmatprep.subr.bf16.mxu0 %v3900_v2  ;;  %2742 = vmatprep.subr.bf16.mxu1 %v3902_v4  ;;  %v3926_v19 = vcombine.high %v993_v52, %v997_v18  ;;  %v3925_v51 = vcombine.low %v993_v52, %v997_v18  ;;  %v3956_v2 = vcombine.high %v1024_v41, %v1028_v42  ;;  %v1049_v52 = vld [vmem:[#allocation2 + $0x2d8] sm:$0xff] }
 0x358   :  { %v3958_v4 = vcombine.high %v1025_v43, %v1029_v45  ;;  %v1053_v18 = vld [vmem:[#allocation2 + $0x2f8] sm:$0xff] }
 0x359   :  { %2661 = vmatpush1.bf16.msra.mxu0 %v3899_v8  ;;  %v3955_v8 = vcombine.low %v1024_v41, %v1028_v42  ;;  %v1073_v37 = vld [vmem:[#allocation2 + $0x398] sm:$0xff]  ;;  %v1080_v41 = vld [vmem:[#allocation2 + $0x3d0] sm:$0xff] }
 0x35a   :  { %2743 = vmatpush1.bf16.msra.mxu1 %v3901_v9  ;;  %2662 = vmatprep.subr.bf16.mxu0 %v3908_v10  ;;  %v3957_v9 = vcombine.low %v1025_v43, %v1029_v45  ;;  %v3964_v10 = vcombine.high %v1032_v5, %v1036_v6  ;;  %v1077_v59 = vld [vmem:[#allocation2 + $0x3b8] sm:$0xff]  ;;  %v1084_v42 = vld [vmem:[#allocation2 + $0x3f0] sm:$0xff] }
 0x35b   :  { %2744 = vmatprep.subr.bf16.mxu1 %v3910_v11  ;;  %v3966_v11 = vcombine.high %v1033_v30, %v1037_v7  ;;  %v1081_v43 = vld [vmem:[#allocation2 + $0x3d8] sm:$0xff] }
 0x35c   :  { %v1085_v45 = vld [vmem:[#allocation2 + $0x3f8] sm:$0xff] }
 0x35d   :  { %2663 = vmatpush1.bf16.msra.mxu0 %v3907_v23  ;;  %v3963_v23 = vcombine.low %v1032_v5, %v1036_v6  ;;  %v1088_v5 = vld [vmem:[#allocation2 + $0x410] sm:$0xff] }
 0x35e   :  { %2745 = vmatpush1.bf16.msra.mxu1 %v3909_v24  ;;  %2664 = vmatprep.subr.bf16.mxu0 %v3916_v25  ;;  %v3965_v24 = vcombine.low %v1033_v30, %v1037_v7  ;;  %v3972_v25 = vcombine.high %v1040_v12, %v1044_v13  ;;  %v1092_v6 = vld [vmem:[#allocation2 + $0x430] sm:$0xff]  ;;  %v1089_v30 = vld [vmem:[#allocation2 + $0x418] sm:$0xff] }
 0x35f   :  { %2746 = vmatprep.subr.bf16.mxu1 %v3918_v26  ;;  %v3974_v26 = vcombine.high %v1041_v16, %v1045_v22  ;;  %v1093_v7 = vld [vmem:[#allocation2 + $0x438] sm:$0xff] }
 0x361   :  { %2665 = vmatpush1.bf16.msra.mxu0 %v3915_v29  ;;  %v3971_v29 = vcombine.low %v1040_v12, %v1044_v13  ;;  %v1096_v12 = vld [vmem:[#allocation2 + $0x450] sm:$0xff] }
 0x362   :  { %2747 = vmatpush1.bf16.msra.mxu1 %v3917_v35  ;;  %2666 = vmatprep.subr.bf16.mxu0 %v3924_v38  ;;  %v3973_v35 = vcombine.low %v1041_v16, %v1045_v22  ;;  %v3980_v38 = vcombine.high %v1048_v27, %v1052_v28  ;;  %v1100_v13 = vld [vmem:[#allocation2 + $0x470] sm:$0xff]  ;;  %v4019_v16 = vcombine.low %v1088_v5, %v1092_v6  ;;  %v1097_v22 = vld [vmem:[#allocation2 + $0x458] sm:$0xff] }
 0x363   :  { %2748 = vmatprep.subr.bf16.mxu1 %v3926_v19  ;;  %v3982_v19 = vcombine.high %v1049_v52, %v1053_v18 }
 0x365   :  { %2667 = vmatpush1.bf16.msra.mxu0 %v3923_v48  ;;  %v3979_v48 = vcombine.low %v1048_v27, %v1052_v28  ;;  %v1108_v27 = vld [vmem:[#allocation2 + $0x4b0] sm:$0xff] }
 0x366   :  { %2749 = vmatpush1.bf16.msra.mxu1 %v3925_v51  ;;  %2668 = vmatprep.subr.bf16.mxu0 %v3932_v49  ;;  %v3981_v51 = vcombine.low %v1049_v52, %v1053_v18  ;;  %v3988_v49 = vcombine.high %v1056_v39, %v1060_v40  ;;  %v1105_v52 = vld [vmem:[#allocation2 + $0x498] sm:$0xff] }
 0x367   :  { %2750 = vmatprep.subr.bf16.mxu1 %v3934_v21  ;;  %v3990_v21 = vcombine.high %v1057_v44, %v1061_v20  ;;  %v1109_v18 = vld [vmem:[#allocation2 + $0x4b8] sm:$0xff] }
 0x369   :  { %2669 = vmatpush1.bf16.msra.mxu0 %v3931_v57  ;;  %v3987_v57 = vcombine.low %v1056_v39, %v1060_v40  ;;  %v1112_v39 = vld [vmem:[#allocation2 + $0x4d0] sm:$0xff] }
 0x36a   :  { %2751 = vmatpush1.bf16.msra.mxu1 %v3933_v58  ;;  %2670 = vmatprep.subr.bf16.mxu0 %v3940_v31  ;;  %v3989_v58 = vcombine.low %v1057_v44, %v1061_v20  ;;  %v3996_v31 = vcombine.high %v1064_v50, %v1068_v53  ;;  %v1116_v40 = vld [vmem:[#allocation2 + $0x4f0] sm:$0xff]  ;;  %v1113_v44 = vld [vmem:[#allocation2 + $0x4d8] sm:$0xff] }
 0x36b   :  { %2752 = vmatprep.subr.bf16.mxu1 %v3942_v32  ;;  %v3998_v32 = vcombine.high %v1065_v55, %v1069_v56  ;;  %v1117_v20 = vld [vmem:[#allocation2 + $0x4f8] sm:$0xff] }
 0x36d   :  { %2671 = vmatpush1.bf16.msra.mxu0 %v3939_v60  ;;  %v3995_v60 = vcombine.low %v1064_v50, %v1068_v53  ;;  %v1124_v50 = vld [vmem:[#allocation2 + $0x530] sm:$0xff]  ;;  %v1121_v53 = vld [vmem:[#allocation2 + $0x518] sm:$0xff] }
 0x36e   :  { %2753 = vmatpush1.bf16.msra.mxu1 %v3941_v61  ;;  %2672 = vmatprep.subr.bf16.mxu0 %v3948_v62  ;;  %v3997_v61 = vcombine.low %v1065_v55, %v1069_v56  ;;  %v4004_v62 = vcombine.high %v1072_v34, %v1076_v36  ;;  %v1125_v55 = vld [vmem:[#allocation2 + $0x538] sm:$0xff]  ;;  %v4045_v56 = vcombine.low %v1113_v44, %v1117_v20 }
 0x36f   :  { %2754 = vmatprep.subr.bf16.mxu1 %v3950_v63  ;;  %v4006_v63 = vcombine.high %v1073_v37, %v1077_v59 }
 0x371   :  { %2673 = vmatpush1.bf16.msra.mxu0 %v3947_v46  ;;  %v4003_v46 = vcombine.low %v1072_v34, %v1076_v36  ;;  %v1129_v34 = vld [vmem:[#allocation2 + $0x558] sm:$0xff] }
 0x372   :  { %2755 = vmatpush1.bf16.msra.mxu1 %v3949_v0  ;;  %2674 = vmatprep.subr.bf16.mxu0 %v3956_v2  ;;  %v4005_v0 = vcombine.low %v1073_v37, %v1077_v59  ;;  %v4012_v2 = vcombine.high %v1080_v41, %v1084_v42  ;;  %v1133_v36 = vld [vmem:[#allocation2 + $0x578] sm:$0xff]  ;;  %v4053_v59 = vcombine.low %v1121_v53, %v1125_v55 }
 0x373   :  { %2756 = vmatprep.subr.bf16.mxu1 %v3958_v4  ;;  %v4014_v4 = vcombine.high %v1081_v43, %v1085_v45 }
 0x375   :  { %2675 = vmatpush1.bf16.msra.mxu0 %v3955_v8  ;;  %v4011_v8 = vcombine.low %v1080_v41, %v1084_v42  ;;  %v1137_v41 = vld [vmem:[#allocation2 + $0x598] sm:$0xff] }
 0x376   :  { %2757 = vmatpush1.bf16.msra.mxu1 %v3957_v9  ;;  %2676 = vmatprep.subr.bf16.mxu0 %v3964_v10  ;;  %v4013_v9 = vcombine.low %v1081_v43, %v1085_v45  ;;  %v4020_v10 = vcombine.high %v1088_v5, %v1092_v6  ;;  %v1141_v42 = vld [vmem:[#allocation2 + $0x5b8] sm:$0xff]  ;;  %v4061_v45 = vcombine.low %v1129_v34, %v1133_v36 }
 0x377   :  { %2758 = vmatprep.subr.bf16.mxu1 %v3966_v11  ;;  %v4022_v11 = vcombine.high %v1089_v30, %v1093_v7  ;;  %v1145_v5 = vld [vmem:[#allocation2 + $0x5d8] sm:$0xff] }
 0x378   :  { %v1149_v6 = vld [vmem:[#allocation2 + $0x5f8] sm:$0xff] }
 0x379   :  { %2677 = vmatpush1.bf16.msra.mxu0 %v3963_v23  ;;  %v1101_v23 = vld [vmem:[#allocation2 + $0x478] sm:$0xff] }
 0x37a   :  { %2759 = vmatpush1.bf16.msra.mxu1 %v3965_v24  ;;  %2678 = vmatprep.subr.bf16.mxu0 %v3972_v25  ;;  %v4021_v24 = vcombine.low %v1089_v30, %v1093_v7  ;;  %v4028_v25 = vcombine.high %v1096_v12, %v1100_v13  ;;  %v4030_v28 = vcombine.high %v1097_v22, %v1101_v23 }
 0x37b   :  { %2760 = vmatprep.subr.bf16.mxu1 %v3974_v26  ;;  %v1104_v26 = vld [vmem:[#allocation2 + $0x490] sm:$0xff]  ;;  %v4069_v7 = vcombine.low %v1137_v41, %v1141_v42 }
 0x37d   :  { %2679 = vmatpush1.bf16.msra.mxu0 %v3971_v29  ;;  %v4027_v29 = vcombine.low %v1096_v12, %v1100_v13  ;;  %v1153_v12 = vld [vmem:[#allocation2 + $0x618] sm:$0xff] }
 0x37e   :  { %2761 = vmatpush1.bf16.msra.mxu1 %v3973_v35  ;;  %2680 = vmatprep.subr.bf16.mxu0 %v3980_v38  ;;  %v4029_v35 = vcombine.low %v1097_v22, %v1101_v23  ;;  %v4036_v38 = vcombine.high %v1104_v26, %v1108_v27  ;;  %v1157_v13 = vld [vmem:[#allocation2 + $0x638] sm:$0xff]  ;;  %v4077_v22 = vcombine.low %v1145_v5, %v1149_v6 }
 0x37f   :  { %2762 = vmatprep.subr.bf16.mxu1 %v3982_v19  ;;  %v4038_v19 = vcombine.high %v1105_v52, %v1109_v18 }
 0x381   :  { %2681 = vmatpush1.bf16.msra.mxu0 %v3979_v48  ;;  %v4035_v48 = vcombine.low %v1104_v26, %v1108_v27  ;;  %v1164_v26 = vld [vmem:[#allocation2 + $0x670] sm:$0xff]  ;;  %v1161_v27 = vld [vmem:[#allocation2 + $0x658] sm:$0xff] }
 0x382   :  { %2763 = vmatpush1.bf16.msra.mxu1 %v3981_v51  ;;  %2682 = vmatprep.subr.bf16.mxu0 %v3988_v49  ;;  %v4044_v51 = vcombine.high %v1112_v39, %v1116_v40  ;;  %v4046_v49 = vcombine.high %v1113_v44, %v1117_v20 }
 0x383   :  { %2764 = vmatprep.subr.bf16.mxu1 %v3990_v21  ;;  %v1120_v21 = vld [vmem:[#allocation2 + $0x510] sm:$0xff] }
 0x384   :  { %v4051_v37 = vcombine.low %v1120_v21, %v1124_v50 }
 0x385   :  { %2683 = vmatpush1.bf16.msra.mxu0 %v3987_v57  ;;  %v4052_v57 = vcombine.high %v1120_v21, %v1124_v50  ;;  %v1177_v21 = vld [vmem:[#allocation2 + $0x6d8] sm:$0xff] }
 0x386   :  { %2765 = vmatpush1.bf16.msra.mxu1 %v3989_v58  ;;  %2684 = vmatprep.subr.bf16.mxu0 %v3996_v31  ;;  %v4054_v58 = vcombine.high %v1121_v53, %v1125_v55  ;;  %v1128_v31 = vld [vmem:[#allocation2 + $0x550] sm:$0xff]  ;;  %v1181_v50 = vld [vmem:[#allocation2 + $0x6f8] sm:$0xff] }
 0x387   :  { %2766 = vmatprep.subr.bf16.mxu1 %v3998_v32  ;;  %v1132_v32 = vld [vmem:[#allocation2 + $0x570] sm:$0xff] }
 0x388   :  { %v4059_v43 = vcombine.low %v1128_v31, %v1132_v32 }
 0x389   :  { %2685 = vmatpush1.bf16.msra.mxu0 %v3995_v60  ;;  %v4060_v60 = vcombine.high %v1128_v31, %v1132_v32  ;;  %v1185_v31 = vld [vmem:[#allocation2 + $0x718] sm:$0xff] }
 0x38a   :  { %2767 = vmatpush1.bf16.msra.mxu1 %v3997_v61  ;;  %2686 = vmatprep.subr.bf16.mxu0 %v4004_v62  ;;  %v4062_v61 = vcombine.high %v1129_v34, %v1133_v36  ;;  %v1136_v62 = vld [vmem:[#allocation2 + $0x590] sm:$0xff]  ;;  %v1189_v32 = vld [vmem:[#allocation2 + $0x738] sm:$0xff]  ;;  %v4109_v36 = vcombine.low %v1177_v21, %v1181_v50 }
 0x38b   :  { %2768 = vmatprep.subr.bf16.mxu1 %v4006_v63  ;;  %v1140_v63 = vld [vmem:[#allocation2 + $0x5b0] sm:$0xff] }
 0x38c   :  { %v4067_v30 = vcombine.low %v1136_v62, %v1140_v63 }
 0x38d   :  { %2687 = vmatpush1.bf16.msra.mxu0 %v4003_v46  ;;  %v4068_v46 = vcombine.high %v1136_v62, %v1140_v63  ;;  %v1193_v62 = vld [vmem:[#allocation2 + $0x758] sm:$0xff] }
 0x38e   :  { %2769 = vmatpush1.bf16.msra.mxu1 %v4005_v0  ;;  %2688 = vmatprep.subr.bf16.mxu0 %v4012_v2  ;;  %v4070_v0 = vcombine.high %v1137_v41, %v1141_v42  ;;  %v1144_v2 = vld [vmem:[#allocation2 + $0x5d0] sm:$0xff]  ;;  %v1197_v63 = vld [vmem:[#allocation2 + $0x778] sm:$0xff]  ;;  %v4117_v42 = vcombine.low %v1185_v31, %v1189_v32 }
 0x38f   :  { %2770 = vmatprep.subr.bf16.mxu1 %v4014_v4  ;;  %v1148_v4 = vld [vmem:[#allocation2 + $0x5f0] sm:$0xff] }
 0x391   :  { %2689 = vmatpush1.bf16.msra.mxu0 %v4011_v8  ;;  %v4076_v8 = vcombine.high %v1144_v2, %v1148_v4 }
 0x392   :  { %2771 = vmatpush1.bf16.msra.mxu1 %v4013_v9  ;;  %2699 = vmatprep.subr.bf16.mxu0 %v4020_v10  ;;  %v4078_v9 = vcombine.high %v1145_v5, %v1149_v6  ;;  %v1152_v10 = vld [vmem:[#allocation2 + $0x610] sm:$0xff]  ;;  %v4125_v6 = vcombine.low %v1193_v62, %v1197_v63 }
 0x393   :  { %2781 = vmatprep.subr.bf16.mxu1 %v4022_v11  ;;  %v1156_v11 = vld [vmem:[#allocation2 + $0x630] sm:$0xff] }
 0x394   :  { %2691 = vmatmul.mubr.bf16.vlgmr.msra.gmra.mrb[12].mxu0 %v5020_v54  ;;  %v4084_v23 = vcombine.high %v1152_v10, %v1156_v11 }
 0x395   :  { %2773 = vmatmul.mubr.bf16.vlgmr.msra.gmra.mrb[12].mxu1 %v5020_v54  ;;  %2700 = vmatpush1.bf16.msra.mxu0 %v4019_v16  ;;  %v4037_v54 = vcombine.low %v1105_v52, %v1109_v18  ;;  %v4075_v16 = vcombine.low %v1144_v2, %v1148_v4  ;;  %v4083_v52 = vcombine.low %v1152_v10, %v1156_v11  ;;  %v1201_v2 = vld [vmem:[#allocation2 + $0x798] sm:$0xff] }
 0x396   :  { %2731 = vmatprep.mubr.bf16.mxu0 %v5026_v33  ;;  %2782 = vmatpush1.bf16.msra.mxu1 %v4021_v24  ;;  %v4086_v24 = vcombine.high %v1153_v12, %v1157_v13  ;;  %v4085_v18 = vcombine.low %v1153_v12, %v1157_v13  ;;  %v1205_v4 = vld [vmem:[#allocation2 + $0x7b8] sm:$0xff] }
 0x397   :  { %2813 = vmatprep.mubr.bf16.mxu1 %v5026_v33  ;;  %2701 = vmatprep.subr.bf16.mxu0 %v4028_v25  ;;  %v4043_v33 = vcombine.low %v1112_v39, %v1116_v40  ;;  %v1160_v25 = vld [vmem:[#allocation2 + $0x650] sm:$0xff]  ;;  %v1169_v39 = vld [vmem:[#allocation2 + $0x698] sm:$0xff]  ;;  %v4133_v13 = vcombine.low %v1201_v2, %v1205_v4 }
 0x398   :  { %2783 = vmatprep.subr.bf16.mxu1 %v4030_v28  ;;  %v1165_v28 = vld [vmem:[#allocation2 + $0x678] sm:$0xff]  ;;  %v4091_v44 = vcombine.low %v1160_v25, %v1164_v26 }
 0x399   :  { %2702 = vmatpush1.bf16.msra.mxu0 %v4027_v29  ;;  %v4092_v29 = vcombine.high %v1160_v25, %v1164_v26  ;;  %v1173_v40 = vld [vmem:[#allocation2 + $0x6b8] sm:$0xff]  ;;  %v4093_v20 = vcombine.low %v1161_v27, %v1165_v28  ;;  %v4452_v25 = vld [vmem:[%s5313_s12 + $0x40] sm:$0xff]  }
 0x39a   :  { %2784 = vmatpush1.bf16.msra.mxu1 %v4029_v35  ;;  %2703 = vmatprep.subr.bf16.mxu0 %v4036_v38  ;;  %v4094_v35 = vcombine.high %v1161_v27, %v1165_v28  ;;  %v1168_v38 = vld [vmem:[#allocation2 + $0x690] sm:$0xff]  ;;  %v4101_v55 = vcombine.low %v1169_v39, %v1173_v40  ;;  %v1209_v10 = vld [vmem:[#allocation2 + $0x7d8] sm:$0xff]  ;;  %v4453_v26 = vld [vmem:[%s5313_s12 + $0xc0] sm:$0xff]  }
 0x39b   :  { %2785 = vmatprep.subr.bf16.mxu1 %v4038_v19  ;;  %v1172_v19 = vld [vmem:[#allocation2 + $0x6b0] sm:$0xff]  ;;  %v1213_v11 = vld [vmem:[#allocation2 + $0x7f8] sm:$0xff]  ;;  %v4454_v27 = vld [vmem:[%s5313_s12] sm:$0xff]  }
 0x39c   :  { %v4099_v53 = vcombine.low %v1168_v38, %v1172_v19  ;;  %v4455_v28 = vld [vmem:[%s5313_s12 + $0x80] sm:$0xff]  }
 0x39d   :  { %2704 = vmatpush1.bf16.msra.mxu0 %v4035_v48  ;;  %v4100_v48 = vcombine.high %v1168_v38, %v1172_v19  ;;  %v4460_v38 = vld [vmem:[%s5313_s12 + $0x50] sm:$0xff]  }
 0x39e   :  { %2786 = vmatpush1.bf16.msra.mxu1 %v4037_v54  ;;  %2705 = vmatprep.subr.bf16.mxu0 %v4044_v51  ;;  %v4102_v54 = vcombine.high %v1169_v39, %v1173_v40  ;;  %v1176_v51 = vld [vmem:[#allocation2 + $0x6d0] sm:$0xff]  ;;  %v4464_v40 = vld [vmem:[%s5313_s12 + $0x58] sm:$0xff]  }
 0x39f   :  { %2787 = vmatprep.subr.bf16.mxu1 %v4046_v49  ;;  %v1180_v49 = vld [vmem:[#allocation2 + $0x6f0] sm:$0xff] }
 0x3a0   :  { %v4107_v34 = vcombine.low %v1176_v51, %v1180_v49  ;;  %v4462_v19 = vld [vmem:[%s5313_s12 + $0x10] sm:$0xff]  }
 0x3a1   :  { %2706 = vmatpush1.bf16.msra.mxu0 %v4043_v33  ;;  %v4108_v33 = vcombine.high %v1176_v51, %v1180_v49  ;;  %v4463_v39 = vld [vmem:[%s5313_s12 + $0x90] sm:$0xff]   ;;  %v4469_v51 = vld [vmem:[%s5313_s12 + $0xe0] sm:$0xff]  }
 0x3a2   :  { %2788 = vmatpush1.bf16.msra.mxu1 %v4045_v56  ;;  %2707 = vmatprep.subr.bf16.mxu0 %v4052_v57  ;;  %v4110_v56 = vcombine.high %v1177_v21, %v1181_v50  ;;  %v1184_v57 = vld [vmem:[#allocation2 + $0x710] sm:$0xff]  ;;  %v4470_v49 = vld [vmem:[%s5313_s12 + $0x20] sm:$0xff]   ;;  %v4472_v50 = vld [vmem:[%s5313_s12 + $0x68] sm:$0xff]  }
 0x3a3   :  { %2789 = vmatprep.subr.bf16.mxu1 %v4054_v58  ;;  %v1188_v58 = vld [vmem:[#allocation2 + $0x730] sm:$0xff]  ;;  %v4471_v21 = vld [vmem:[%s5313_s12 + $0xa0] sm:$0xff]  }
 0x3a4   :  { %v4115_v41 = vcombine.low %v1184_v57, %v1188_v58 }
 0x3a5   :  { %2708 = vmatpush1.bf16.msra.mxu0 %v4051_v37  ;;  %v4116_v37 = vcombine.high %v1184_v57, %v1188_v58  ;;  %v4477_v57 = vld [vmem:[%s5313_s12 + $0xf0] sm:$0xff]  }
 0x3a6   :  { %2790 = vmatpush1.bf16.msra.mxu1 %v4053_v59  ;;  %2709 = vmatprep.subr.bf16.mxu0 %v4060_v60  ;;  %v4118_v59 = vcombine.high %v1185_v31, %v1189_v32  ;;  %v1192_v60 = vld [vmem:[#allocation2 + $0x750] sm:$0xff]  ;;  %v4480_v32 = vld [vmem:[%s5313_s12 + $0x78] sm:$0xff]  }
 0x3a7   :  { %2791 = vmatprep.subr.bf16.mxu1 %v4062_v61  ;;  %v1196_v61 = vld [vmem:[#allocation2 + $0x770] sm:$0xff] }
 0x3a8   :  { %v4123_v5 = vcombine.low %v1192_v60, %v1196_v61  ;;  %v4478_v58 = vld [vmem:[%s5313_s12 + $0x30] sm:$0xff]  }
 0x3a9   :  { %2710 = vmatpush1.bf16.msra.mxu0 %v4059_v43  ;;  %v4124_v43 = vcombine.high %v1192_v60, %v1196_v61  ;;  %v4479_v31 = vld [vmem:[%s5313_s12 + $0xb0] sm:$0xff]  }
 0x3aa   :  { %2792 = vmatpush1.bf16.msra.mxu1 %v4061_v45  ;;  %2711 = vmatprep.subr.bf16.mxu0 %v4068_v46  ;;  %v4126_v45 = vcombine.high %v1193_v62, %v1197_v63  ;;  %v1200_v46 = vld [vmem:[#allocation2 + $0x790] sm:$0xff] }
 0x3ab   :  { %2793 = vmatprep.subr.bf16.mxu1 %v4070_v0  ;;  %v1204_v0 = vld [vmem:[#allocation2 + $0x7b0] sm:$0xff] }
 0x3ac   :  { %v4131_v12 = vcombine.low %v1200_v46, %v1204_v0 }
 0x3ad   :  { %2712 = vmatpush1.bf16.msra.mxu0 %v4067_v30  ;;  %v4132_v30 = vcombine.high %v1200_v46, %v1204_v0 }
 0x3ae   :  { %2794 = vmatpush1.bf16.msra.mxu1 %v4069_v7  ;;  %2713 = vmatprep.subr.bf16.mxu0 %v4076_v8  ;;  %v4134_v7 = vcombine.high %v1201_v2, %v1205_v4  ;;  %v1208_v8 = vld [vmem:[#allocation2 + $0x7d0] sm:$0xff] }
 0x3af   :  { %2795 = vmatprep.subr.bf16.mxu1 %v4078_v9  ;;  %v1212_v9 = vld [vmem:[#allocation2 + $0x7f0] sm:$0xff] }
 0x3b1   :  { %2714 = vmatpush1.bf16.msra.mxu0 %v4075_v16  ;;  %v4140_v16 = vcombine.high %v1208_v8, %v1212_v9 }
 0x3b2   :  { %2796 = vmatpush1.bf16.msra.mxu1 %v4077_v22  ;;  %2715 = vmatprep.subr.bf16.mxu0 %v4084_v23  ;;  %v4142_v22 = vcombine.high %v1209_v10, %v1213_v11  ;;  %v4139_v23 = vcombine.low %v1208_v8, %v1212_v9 }
 0x3b3   :  { %2797 = vmatprep.subr.bf16.mxu1 %v4086_v24  ;;  %v4141_v24 = vcombine.low %v1209_v10, %v1213_v11 }
 0x3b5   :  { %2716 = vmatpush1.bf16.msra.mxu0 %v4083_v52  ;;  %v4456_v52 = vld [vmem:[%s5313_s12 + $0x48] sm:$0xff]  }
 0x3b6   :  { %2798 = vmatpush1.bf16.msra.mxu1 %v4085_v18  ;;  %2717 = vmatprep.subr.bf16.mxu0 %v4092_v29  ;;  %v4457_v18 = vld [vmem:[%s5313_s12 + $0xc8] sm:$0xff]  }
 0x3b7   :  { %2799 = vmatprep.subr.bf16.mxu1 %v4094_v35  ;;  %v4458_v29 = vld [vmem:[%s5313_s12 + $0x8] sm:$0xff]  }
 0x3b8   :  { %v4459_v35 = vld [vmem:[%s5313_s12 + $0x88] sm:$0xff]  }
 0x3b9   :  { %2718 = vmatpush1.bf16.msra.mxu0 %v4091_v44  ;;  %v4465_v44 = vld [vmem:[%s5313_s12 + $0xd8] sm:$0xff]  }
 0x3ba   :  { %2800 = vmatpush1.bf16.msra.mxu1 %v4093_v20  ;;  %2719 = vmatprep.subr.bf16.mxu0 %v4100_v48  ;;  %v4466_v20 = vld [vmem:[%s5313_s12 + $0x18] sm:$0xff]  }
 0x3bb   :  { %2801 = vmatprep.subr.bf16.mxu1 %v4102_v54  ;;  %v4467_v48 = vld [vmem:[%s5313_s12 + $0x98] sm:$0xff]   ;;  %v4468_v54 = vld [vmem:[%s5313_s12 + $0x60] sm:$0xff]  }
 0x3bd   :  { %2720 = vmatpush1.bf16.msra.mxu0 %v4099_v53  ;;  %v4473_v53 = vld [vmem:[%s5313_s12 + $0xe8] sm:$0xff]  }
 0x3be   :  { %2802 = vmatpush1.bf16.msra.mxu1 %v4101_v55  ;;  %2721 = vmatprep.subr.bf16.mxu0 %v4108_v33  ;;  %v4474_v55 = vld [vmem:[%s5313_s12 + $0x28] sm:$0xff]  }
 0x3bf   :  { %2803 = vmatprep.subr.bf16.mxu1 %v4110_v56  ;;  %v4475_v33 = vld [vmem:[%s5313_s12 + $0xa8] sm:$0xff]   ;;  %v4476_v56 = vld [vmem:[%s5313_s12 + $0x70] sm:$0xff]  }
 0x3c1   :  { %2722 = vmatpush1.bf16.msra.mxu0 %v4107_v34  ;;  %v4481_v34 = vld [vmem:[%s5313_s12 + $0xf8] sm:$0xff]  }
 0x3c2   :  { %2804 = vmatpush1.bf16.msra.mxu1 %v4109_v36  ;;  %2723 = vmatprep.subr.bf16.mxu0 %v4116_v37  ;;  %v4482_v36 = vld [vmem:[%s5313_s12 + $0x38] sm:$0xff]  }
 0x3c3   :  { %2805 = vmatprep.subr.bf16.mxu1 %v4118_v59  ;;  %v4483_v37 = vld [vmem:[%s5313_s12 + $0xb8] sm:$0xff]  }
 0x3c5   :  { %2724 = vmatpush1.bf16.msra.mxu0 %v4115_v41 }
 0x3c6   :  { %2806 = vmatpush1.bf16.msra.mxu1 %v4117_v42  ;;  %2725 = vmatprep.subr.bf16.mxu0 %v4124_v43 }
 0x3c7   :  { %2807 = vmatprep.subr.bf16.mxu1 %v4126_v45 }
 0x3c9   :  { %2726 = vmatpush1.bf16.msra.mxu0 %v4123_v5 }
 0x3ca   :  { %2808 = vmatpush1.bf16.msra.mxu1 %v4125_v6  ;;  %2727 = vmatprep.subr.bf16.mxu0 %v4132_v30 }
 0x3cb   :  { %2809 = vmatprep.subr.bf16.mxu1 %v4134_v7 }
 0x3cd   :  { %2728 = vmatpush1.bf16.msra.mxu0 %v4131_v12 }
 0x3ce   :  { %2810 = vmatpush1.bf16.msra.mxu1 %v4133_v13  ;;  %2729 = vmatprep.subr.bf16.mxu0 %v4140_v16 }
 0x3cf   :  { %2811 = vmatprep.subr.bf16.mxu1 %v4142_v22 }
 0x3d1   :  { %2730 = vmatpush1.bf16.msra.mxu0 %v4139_v23 }
 0x3d2   :  { %2812 = vmatpush1.bf16.msra.mxu1 %v4141_v24  ;;  %4211 = vmatprep.subr.bf16.mxu0 %v4452_v25 }
 0x3d3   :  { %4233 = vmatprep.subr.bf16.mxu1 %v4453_v26 }
 0x3d4   :  { %2732 = vmatmul.mubr.bf16.vlgmr.msra.gmra.mrb[12].mxu0 %v5039_v47 }
 0x3d5   :  { %2814 = vmatmul.mubr.bf16.vlgmr.msra.gmra.mrb[12].mxu1 %v5039_v47  ;;  %4212 = vmatpush3.bf16.msra.mxu0 %v4454_v27  ;;  %v4461_v47 = vld [vmem:[%s5313_s12 + $0xd0] sm:$0xff]  }
 0x3d6   :  { %4234 = vmatpush3.bf16.msra.mxu1 %v4455_v28  ;;  %4213 = vmatprep.subr.bf16.mxu0 %v4456_v52 }
 0x3d7   :  { %4235 = vmatprep.subr.bf16.mxu1 %v4457_v18 }
 0x3d9   :  { %4214 = vmatpush3.bf16.msra.mxu0 %v4458_v29 }
 0x3da   :  { %4236 = vmatpush3.bf16.msra.mxu1 %v4459_v35  ;;  %4215 = vmatprep.subr.bf16.mxu0 %v4460_v38 }
 0x3db   :  { %4237 = vmatprep.subr.bf16.mxu1 %v4461_v47 }
 0x3dd   :  { %4216 = vmatpush3.bf16.msra.mxu0 %v4462_v19 }
 0x3de   :  { %4238 = vmatpush3.bf16.msra.mxu1 %v4463_v39  ;;  %4217 = vmatprep.subr.bf16.mxu0 %v4464_v40 }
 0x3df   :  { %4239 = vmatprep.subr.bf16.mxu1 %v4465_v44 }
 0x3e1   :  { %4218 = vmatpush3.bf16.msra.mxu0 %v4466_v20 }
 0x3e2   :  { %4240 = vmatpush3.bf16.msra.mxu1 %v4467_v48  ;;  %4219 = vmatprep.subr.bf16.mxu0 %v4468_v54 }
 0x3e3   :  { %4241 = vmatprep.subr.bf16.mxu1 %v4469_v51 }
 0x3e5   :  { %4220 = vmatpush3.bf16.msra.mxu0 %v4470_v49 }
 0x3e6   :  { %4242 = vmatpush3.bf16.msra.mxu1 %v4471_v21  ;;  %4221 = vmatprep.subr.bf16.mxu0 %v4472_v50 }
 0x3e7   :  { %4243 = vmatprep.subr.bf16.mxu1 %v4473_v53 }
 0x3e9   :  { %4222 = vmatpush3.bf16.msra.mxu0 %v4474_v55 }
 0x3ea   :  { %4244 = vmatpush3.bf16.msra.mxu1 %v4475_v33  ;;  %4223 = vmatprep.subr.bf16.mxu0 %v4476_v56 }
 0x3eb   :  { %4245 = vmatprep.subr.bf16.mxu1 %v4477_v57 }
 0x3ed   :  { %4224 = vmatpush3.bf16.msra.mxu0 %v4478_v58 }
 0x3ee   :  { %4246 = vmatpush3.bf16.msra.mxu1 %v4479_v31  ;;  %4225 = vmatprep.subr.bf16.mxu0 %v4480_v32 }
 0x3ef   :  { %4247 = vmatprep.subr.bf16.mxu1 %v4481_v34 }
 0x3f1   :  { %4226 = vmatpush3.bf16.msra.mxu0 %v4482_v36 }
 0x3f2   :  { %4248 = vmatpush3.bf16.msra.mxu1 %v4483_v37 }
 0x427   :  { %v2569_v59 = vpop.f32.mrb[8].mxu0  ;;  %v2651_v60 = vpop.f32.mrb[8].mxu1 }
 0x428   :  { %v2822_v61 = vrot.slane %v2569_v59, 4  ;;  %v2834_v62 = vrot.slane %v2651_v60, 4  ;;  %v2571_v63 = vpop.f32.mrb[9].mxu0  ;;  %v2653_v41 = vpop.f32.mrb[9].mxu1 }
 0x429   :  { %v2828_v42 = vrot.slane %v2571_v63, 4  ;;  %v2840_v43 = vrot.slane %v2653_v41, 4  ;;  %v2573_v45 = vpop.f32.mrb[10].mxu0  ;;  %v2655_v46 = vpop.f32.mrb[10].mxu1 }
 0x42a   :  { %v2823_v0 = vadd.f32 %v2822_v61, %v2569_v59  ;;  %v2835_v2 = vadd.f32 %v2834_v62, %v2651_v60  ;;  %v2574_v4 = vpop.f32.mrb[11].mxu0  ;;  %v2656_v5 = vpop.f32.mrb[11].mxu1  ;;  %v4484_v62 = vld [vmem:[%s5313_s12 + $0x140] sm:$0xff]  }
 0x42b   :  { %v2829_v6 = vadd.f32 %v2828_v42, %v2571_v63  ;;  %v2841_v30 = vadd.f32 %v2840_v43, %v2653_v41  ;;  %4255 = vmatprep.subr.bf16.mxu0 %v4484_v62  ;;  %v4495_v62 = vld [vmem:[%s5313_s12 + $0x190] sm:$0xff]  }
 0x42c   :  { %v2824_v7 = vrot.slane %v2823_v0, 2  ;;  %v2836_v8 = vrot.slane %v2835_v2, 2 }
 0x42d   :  { %v2830_v9 = vrot.slane %v2829_v6, 2  ;;  %v2842_v10 = vrot.slane %v2841_v30, 2 }
 0x42e   :  { %v2825_v11 = vadd.f32 %v2824_v7, %v2823_v0  ;;  %v2837_v12 = vadd.f32 %v2836_v8, %v2835_v2 }
 0x42f   :  { %v2831_v13 = vadd.f32 %v2830_v9, %v2829_v6  ;;  %v2843_v16 = vadd.f32 %v2842_v10, %v2841_v30  ;;  %v5160_v10 = vld [vmem:[%s5311_s10] sm:$0xff] }
 0x430   :  { %v2826_v22 = vrot.slane %v2825_v11, 1  ;;  %v2838_v23 = vrot.slane %v2837_v12, 1 }
 0x431   :  { %v2832_v24 = vrot.slane %v2831_v13, 1  ;;  %v2844_v25 = vrot.slane %v2843_v16, 1 }
 0x432   :  { %v2827_v26 = vadd.f32 %v2826_v22, %v2825_v11  ;;  %v2839_v27 = vadd.f32 %v2838_v23, %v2837_v12  ;;  %v5165_v11 = vld [vmem:[%s5312_s11] sm:$0xff]  ;;  %v2979_v12 = vrot.slane %v5160_v10, %v4959_v15 }
 0x433   :  { %v2833_v28 = vadd.f32 %v2832_v24, %v2831_v13  ;;  %v2845_v52 = vadd.f32 %v2844_v25, %v2843_v16  ;;  %v2987_v16 = vrot.slane %v5160_v10, %v5000_v1  ;;  %v3029_v24 = vrot.slane %v5165_v11, %v4959_v15 }
 0x434   :  { %v2870_v18 = vmul.f32 0.125, %v2827_v26  ;;  %v2872_v29 = vmul.f32 0.125, %v2839_v27  ;;  %v2983_v25 = vrot.slane %v5160_v10, %v4965_v17 }
 0x435   :  { %v2871_v35 = vmul.f32 0.125, %v2833_v28  ;;  %v2873_v38 = vmul.f32 0.125, %v2845_v52  ;;  %v3037_v28 = vrot.slane %v5165_v11, %v5000_v1  ;;  %v2991_v52 = vrot.slane %v5160_v10, %v5006_v3 }
 0x436   :  { %v2878_v47 = vsub.f32 %v2569_v59, %v2870_v18  ;;  %v2880_v19 = vsub.f32 %v2651_v60, %v2872_v29 }
 0x437   :  { %v2879_v39 = vsub.f32 %v2571_v63, %v2871_v35  ;;  %v5147_v40 = vsub.f32 %v2653_v41, %v2873_v38  ;;  %v4485_v63 = vld [vmem:[%s5313_s12 + $0x1c0] sm:$0xff]   ;;  %v3033_v38 = vrot.slane %v5165_v11, %v4965_v17 }
 0x438   :  { %v2886_v44 = vmul.f32 %v2878_v47, %v2878_v47  ;;  %v2888_v20 = vmul.f32 %v2880_v19, %v2880_v19  ;;  %4277 = vmatprep.subr.bf16.mxu1 %v4485_v63  ;;  %v4496_v63 = vld [vmem:[%s5313_s12 + $0x158] sm:$0xff]  }
 0x439   :  { %v2887_v48 = vmul.f32 %v2879_v39, %v2879_v39  ;;  %v2889_v54 = vmul.f32 %v5147_v40, %v5147_v40 }
 0x43a   :  { %v2894_v51 = vrot.slane %v2886_v44, 4  ;;  %v2906_v49 = vrot.slane %v2888_v20, 4 }
 0x43b   :  { %v2900_v21 = vrot.slane %v2887_v48, 4  ;;  %v2912_v50 = vrot.slane %v2889_v54, 4 }
 0x43c   :  { %v2895_v53 = vadd.f32 %v2894_v51, %v2886_v44  ;;  %v2907_v55 = vadd.f32 %v2906_v49, %v2888_v20  ;;  %v3041_v44 = vrot.slane %v5165_v11, %v5006_v3  ;;  %v4486_v3 = vld [vmem:[%s5313_s12 + $0x100] sm:$0xff]  }
 0x43d   :  { %v2901_v33 = vadd.f32 %v2900_v21, %v2887_v48  ;;  %v2913_v56 = vadd.f32 %v2912_v50, %v2889_v54 }
 0x43e   :  { %v2896_v57 = vrot.slane %v2895_v53, 2  ;;  %v2908_v58 = vrot.slane %v2907_v55, 2 }
 0x43f   :  { %v2902_v31 = vrot.slane %v2901_v33, 2  ;;  %v2914_v32 = vrot.slane %v2913_v56, 2 }
 0x440   :  { %v2897_v34 = vadd.f32 %v2896_v57, %v2895_v53  ;;  %v2909_v36 = vadd.f32 %v2908_v58, %v2907_v55  ;;  %v4487_v58 = vld [vmem:[%s5313_s12 + $0x180] sm:$0xff]  }
 0x441   :  { %v2903_v37 = vadd.f32 %v2902_v31, %v2901_v33  ;;  %v2915_v59 = vadd.f32 %v2914_v32, %v2913_v56  ;;  %v4488_v31 = vld [vmem:[%s5313_s12 + $0x148] sm:$0xff]  }
 0x442   :  { %v2898_v60 = vrot.slane %v2897_v34, 1  ;;  %v2910_v61 = vrot.slane %v2909_v36, 1 }
 0x443   :  { %v2904_v41 = vrot.slane %v2903_v37, 1  ;;  %v2916_v42 = vrot.slane %v2915_v59, 1 }
 0x444   :  { %v2899_v43 = vadd.f32 %v2898_v60, %v2897_v34  ;;  %v2911_v45 = vadd.f32 %v2910_v61, %v2909_v36  ;;  %v4489_v34 = vld [vmem:[%s5313_s12 + $0x1c8] sm:$0xff]   ;;  %v4493_v60 = vld [vmem:[%s5313_s12 + $0x1d0] sm:$0xff]  }
 0x445   :  { %v2905_v46 = vadd.f32 %v2904_v41, %v2903_v37  ;;  %v2917_v0 = vadd.f32 %v2916_v42, %v2915_v59  ;;  %v4490_v36 = vld [vmem:[%s5313_s12 + $0x108] sm:$0xff]   ;;  %v4492_v59 = vld [vmem:[%s5313_s12 + $0x150] sm:$0xff]   ;;  %v4497_v41 = vld [vmem:[%s5313_s12 + $0x1d8] sm:$0xff]  }
 0x446   :  { %v2942_v2 = vmul.f32 0.125, %v2899_v43  ;;  %v2944_v4 = vmul.f32 0.125, %v2911_v45  ;;  %v4491_v37 = vld [vmem:[%s5313_s12 + $0x188] sm:$0xff]   ;;  %v4494_v61 = vld [vmem:[%s5313_s12 + $0x110] sm:$0xff]   ;;  %v4498_v42 = vld [vmem:[%s5313_s12 + $0x118] sm:$0xff]  }
 0x447   :  { %v2943_v5 = vmul.f32 0.125, %v2905_v46  ;;  %v2945_v6 = vmul.f32 0.125, %v2917_v0  ;;  %v4499_v43 = vld [vmem:[%s5313_s12 + $0x198] sm:$0xff]   ;;  %v4500_v45 = vld [vmem:[%s5313_s12 + $0x160] sm:$0xff]  }
 0x448   :  { %v2950_v30 = vadd.f32 0.8, %v2942_v2  ;;  %v2952_v7 = vadd.f32 0.8, %v2944_v4  ;;  %v4501_v46 = vld [vmem:[%s5313_s12 + $0x1e0] sm:$0xff]   ;;  %v4504_v4 = vld [vmem:[%s5313_s12 + $0x168] sm:$0xff]  }
 0x449   :  { %v2951_v8 = vadd.f32 0.8, %v2943_v5  ;;  %v2953_v9 = vadd.f32 0.8, %v2945_v6  ;;  %v4502_v0 = vld [vmem:[%s5313_s12 + $0x120] sm:$0xff]   ;;  %v4505_v5 = vld [vmem:[%s5313_s12 + $0x1e8] sm:$0xff]  }
 0x44a   :  { %4528 = vrsqrt.f32 %v2950_v30  ;;  %v4503_v2 = vld [vmem:[%s5313_s12 + $0x1a0] sm:$0xff]   ;;  %v4506_v6 = vld [vmem:[%s5313_s12 + $0x128] sm:$0xff]  }
 0x44b   :  { %4530 = vrsqrt.f32 %v2952_v7  ;;  %v4507_v30 = vld [vmem:[%s5313_s12 + $0x1a8] sm:$0xff]   ;;  %v4508_v7 = vld [vmem:[%s5313_s12 + $0x170] sm:$0xff]  }
 0x44c   :  { %4532 = vrsqrt.f32 %v2951_v8  ;;  %v4509_v8 = vld [vmem:[%s5313_s12 + $0x1f0] sm:$0xff]  }
 0x44d   :  { %4534 = vrsqrt.f32 %v2953_v9  ;;  %v4510_v9 = vld [vmem:[%s5313_s12 + $0x130] sm:$0xff]  }
 0x454   :  { %v4529_v13 = vpop.eup %4528 }
 0x455   :  { %v4531_v22 = vpop.eup %4530  ;;  %v2966_v23 = vmul.f32 %v4529_v13, %v2878_v47  ;;  %v4512_v13 = vld [vmem:[%s5313_s12 + $0x178] sm:$0xff]  }
 0x456   :  { %v4533_v26 = vpop.eup %4532  ;;  %v2968_v27 = vmul.f32 %v4531_v22, %v2880_v19  ;;  %v4514_v22 = vld [vmem:[%s5313_s12 + $0x138] sm:$0xff]  }
 0x457   :  { %v4535_v18 = vpop.eup %4534  ;;  %v3016_v29 = vmul.f32 %v2979_v12, %v2966_v23  ;;  %v2967_v35 = vmul.f32 %v4533_v26, %v2879_v39  ;;  %v4511_v12 = vld [vmem:[%s5313_s12 + $0x1b0] sm:$0xff]   ;;  %v4515_v23 = vld [vmem:[%s5313_s12 + $0x1b8] sm:$0xff]  }
 0x458   :  { %v3018_v47 = vmul.f32 %v2987_v16, %v2968_v27  ;;  %v2969_v15 = vmul.f32 %v4535_v18, %v5147_v40  ;;  %v4513_v16 = vld [vmem:[%s5313_s12 + $0x1f8] sm:$0xff]  }
 0x459   :  { %v3066_v20 = vadd.f32 %v3029_v24, %v3016_v29  ;;  %v3017_v19 = vmul.f32 %v2983_v25, %v2967_v35 }
 0x45a   :  { %v3068_v48 = vadd.f32 %v3037_v28, %v3018_v47  ;;  %v3019_v54 = vmul.f32 %v2991_v52, %v2969_v15 }
 0x45b   :  { %v3067_v1 = vadd.f32 %v3033_v38, %v3017_v19  ;;  %vm3074_vm9 = vcmp.gt.f32.partialorder %v3066_v20, 0.0  ;;  %v3082_v51 = vmul.f32 0.2, %v3066_v20 }
 0x45c   :  { %v3069_v49 = vadd.f32 %v3041_v44, %v3019_v54  ;;  %vm3076_vm10 = vcmp.gt.f32.partialorder %v3068_v48, 0.0  ;;  %v3084_v21 = vmul.f32 0.2, %v3068_v48 }
 0x45d   :  { %vm3075_vm11 = vcmp.gt.f32.partialorder %v3067_v1, 0.0  ;;  %v3083_v39 = vmul.f32 0.2, %v3067_v1  ;;  %v3090_v50 = vsel %vm3074_vm9, %v3066_v20, %v3082_v51 }
 0x45e   :  { %vm3077_vm12 = vcmp.gt.f32.partialorder %v3069_v49, 0.0  ;;  %v3085_v17 = vmul.f32 0.2, %v3069_v49  ;;  %v3092_v40 = vsel %vm3076_vm10, %v3068_v48, %v3084_v21  ;;  %v3098_v57 = vpack.c.bf16 %v3090_v50, %v3090_v50 }
 0x45f   :  { %v3091_v53 = vsel %vm3075_vm11, %v3067_v1, %v3083_v39  ;;  %v3100_v32 = vpack.c.bf16 %v3092_v40, %v3092_v40 }
 0x460   :  { %v3099_v55 = vpack.c.bf16 %v3091_v53, %v3091_v53  ;;  %v3093_v33 = vsel %vm3077_vm12, %v3069_v49, %v3085_v17 }
 0x461   :  { %v3101_v56 = vpack.c.bf16 %v3093_v33, %v3093_v33 }
 0x462   :  { %3657 = vmatprep.mubr.bf16.mxu0 %v3099_v55 }
 0x463   :  { %3697 = vmatprep.mubr.bf16.mxu1 %v3101_v56  ;;  %3658 = vmatmul.mubr.bf16.vlgmr.msra.gmra.mrb[16].mxu0 %v3098_v57 }
 0x464   :  { %3698 = vmatmul.mubr.bf16.vlgmr.msra.gmra.mrb[16].mxu1 %v3100_v32  ;;  %4256 = vmatpush3.bf16.msra.mxu0 %v4486_v3 }
 0x465   :  { %4278 = vmatpush3.bf16.msra.mxu1 %v4487_v58  ;;  %4257 = vmatprep.subr.bf16.mxu0 %v4488_v31 }
 0x466   :  { %4279 = vmatprep.subr.bf16.mxu1 %v4489_v34 }
 0x468   :  { %4258 = vmatpush3.bf16.msra.mxu0 %v4490_v36 }
 0x469   :  { %4280 = vmatpush3.bf16.msra.mxu1 %v4491_v37  ;;  %4259 = vmatprep.subr.bf16.mxu0 %v4492_v59 }
 0x46a   :  { %4281 = vmatprep.subr.bf16.mxu1 %v4493_v60 }
 0x46c   :  { %4260 = vmatpush3.bf16.msra.mxu0 %v4494_v61 }
 0x46d   :  { %4282 = vmatpush3.bf16.msra.mxu1 %v4495_v62  ;;  %4261 = vmatprep.subr.bf16.mxu0 %v4496_v63 }
 0x46e   :  { %4283 = vmatprep.subr.bf16.mxu1 %v4497_v41 }
 0x470   :  { %4262 = vmatpush3.bf16.msra.mxu0 %v4498_v42 }
 0x471   :  { %4284 = vmatpush3.bf16.msra.mxu1 %v4499_v43  ;;  %4263 = vmatprep.subr.bf16.mxu0 %v4500_v45 }
 0x472   :  { %4285 = vmatprep.subr.bf16.mxu1 %v4501_v46 }
 0x474   :  { %4264 = vmatpush3.bf16.msra.mxu0 %v4502_v0 }
 0x475   :  { %4286 = vmatpush3.bf16.msra.mxu1 %v4503_v2  ;;  %4265 = vmatprep.subr.bf16.mxu0 %v4504_v4 }
 0x476   :  { %4287 = vmatprep.subr.bf16.mxu1 %v4505_v5 }
 0x478   :  { %4266 = vmatpush3.bf16.msra.mxu0 %v4506_v6 }
 0x479   :  { %4288 = vmatpush3.bf16.msra.mxu1 %v4507_v30  ;;  %4267 = vmatprep.subr.bf16.mxu0 %v4508_v7 }
 0x47a   :  { %4289 = vmatprep.subr.bf16.mxu1 %v4509_v8 }
 0x47c   :  { %4268 = vmatpush3.bf16.msra.mxu0 %v4510_v9 }
 0x47d   :  { %4290 = vmatpush3.bf16.msra.mxu1 %v4511_v12  ;;  %4269 = vmatprep.subr.bf16.mxu0 %v4512_v13 }
 0x47e   :  { %4291 = vmatprep.subr.bf16.mxu1 %v4513_v16 }
 0x480   :  { %4270 = vmatpush3.bf16.msra.mxu0 %v4514_v22 }
 0x481   :  { %4292 = vmatpush3.bf16.msra.mxu1 %v4515_v23 }
 0x4a7   :  { %v2733_v24 = vpop.f32.mrb[12].mxu0 }
 0x4a8   :  { %v2846_v25 = vrot.slane %v2733_v24, 4  ;;  %v2815_v26 = vpop.f32.mrb[12].mxu1  ;;  %v2735_v27 = vpop.f32.mrb[13].mxu0 }
 0x4a9   :  { %v2858_v28 = vrot.slane %v2815_v26, 4  ;;  %v2852_v52 = vrot.slane %v2735_v27, 4  ;;  %v2817_v18 = vpop.f32.mrb[13].mxu1  ;;  %v2737_v29 = vpop.f32.mrb[14].mxu0 }
 0x4aa   :  { %v2847_v35 = vadd.f32 %v2846_v25, %v2733_v24  ;;  %v2864_v38 = vrot.slane %v2817_v18, 4  ;;  %v2819_v47 = vpop.f32.mrb[14].mxu1  ;;  %v2738_v15 = vpop.f32.mrb[15].mxu0 }
 0x4ab   :  { %v2859_v44 = vadd.f32 %v2858_v28, %v2815_v26  ;;  %v2853_v20 = vadd.f32 %v2852_v52, %v2735_v27  ;;  %v2820_v19 = vpop.f32.mrb[15].mxu1 }
 0x4ac   :  { %v2848_v48 = vrot.slane %v2847_v35, 2  ;;  %v2865_v54 = vadd.f32 %v2864_v38, %v2817_v18 }
 0x4ad   :  { %v2860_v1 = vrot.slane %v2859_v44, 2  ;;  %v2854_v51 = vrot.slane %v2853_v20, 2 }
 0x4ae   :  { %v2849_v49 = vadd.f32 %v2848_v48, %v2847_v35  ;;  %v2866_v21 = vrot.slane %v2865_v54, 2  ;;  %v2994_v48 = vsub.s32 4, %v4956_v14 }
 0x4af   :  { %v2861_v39 = vadd.f32 %v2860_v1, %v2859_v44  ;;  %v2855_v17 = vadd.f32 %v2854_v51, %v2853_v20  ;;  %v2998_v1 = vsub.s32 5, %v4956_v14  ;;  %v3006_v51 = vsub.s32 7, %v4956_v14 }
 0x4b0   :  { %v2850_v50 = vrot.slane %v2849_v49, 1  ;;  %v2867_v53 = vadd.f32 %v2866_v21, %v2865_v54  ;;  %v3002_v54 = vsub.s32 6, %v4956_v14 }
 0x4b1   :  { %v2862_v40 = vrot.slane %v2861_v39, 1  ;;  %v2856_v55 = vrot.slane %v2855_v17, 1 }
 0x4b2   :  { %v2851_v33 = vadd.f32 %v2850_v50, %v2849_v49  ;;  %v2868_v3 = vrot.slane %v2867_v53, 1  ;;  %v2995_v49 = vrot.slane %v5160_v10, %v2994_v48 }
 0x4b3   :  { %v2863_v56 = vadd.f32 %v2862_v40, %v2861_v39  ;;  %v2857_v57 = vadd.f32 %v2856_v55, %v2855_v17  ;;  %v3003_v39 = vrot.slane %v5160_v10, %v3002_v54  ;;  %v2999_v40 = vrot.slane %v5160_v10, %v2998_v1 }
 0x4b4   :  { %v2874_v58 = vmul.f32 0.125, %v2851_v33  ;;  %v2869_v31 = vadd.f32 %v2868_v3, %v2867_v53  ;;  %v3045_v53 = vrot.slane %v5165_v11, %v2994_v48  ;;  %v3053_v3 = vrot.slane %v5165_v11, %v3002_v54 }
 0x4b5   :  { %v2876_v32 = vmul.f32 0.125, %v2863_v56  ;;  %v2875_v34 = vmul.f32 0.125, %v2857_v57  ;;  %v3007_v56 = vrot.slane %v5160_v10, %v3006_v51 }
 0x4b6   :  { %v2882_v36 = vsub.f32 %v2733_v24, %v2874_v58  ;;  %v2877_v37 = vmul.f32 0.125, %v2869_v31  ;;  %v3049_v31 = vrot.slane %v5165_v11, %v2998_v1 }
 0x4b7   :  { %v2884_v59 = vsub.f32 %v2815_v26, %v2876_v32  ;;  %v2883_v60 = vsub.f32 %v2735_v27, %v2875_v34 }
 0x4b8   :  { %v2890_v61 = vmul.f32 %v2882_v36, %v2882_v36  ;;  %v2885_v62 = vsub.f32 %v2817_v18, %v2877_v37  ;;  %v3057_v37 = vrot.slane %v5165_v11, %v3006_v51 }
 0x4b9   :  { %v2892_v63 = vmul.f32 %v2884_v59, %v2884_v59  ;;  %v2891_v41 = vmul.f32 %v2883_v60, %v2883_v60 }
 0x4ba   :  { %v2918_v42 = vrot.slane %v2890_v61, 4  ;;  %v2893_v43 = vmul.f32 %v2885_v62, %v2885_v62 }
 0x4bb   :  { %v2930_v45 = vrot.slane %v2892_v63, 4  ;;  %v2924_v46 = vrot.slane %v2891_v41, 4 }
 0x4bc   :  { %v2919_v0 = vadd.f32 %v2918_v42, %v2890_v61  ;;  %v2936_v2 = vrot.slane %v2893_v43, 4 }
 0x4bd   :  { %v2931_v4 = vadd.f32 %v2930_v45, %v2892_v63  ;;  %v2925_v5 = vadd.f32 %v2924_v46, %v2891_v41 }
 0x4be   :  { %v2920_v6 = vrot.slane %v2919_v0, 2  ;;  %v2937_v30 = vadd.f32 %v2936_v2, %v2893_v43 }
 0x4bf   :  { %v2932_v7 = vrot.slane %v2931_v4, 2  ;;  %v2926_v8 = vrot.slane %v2925_v5, 2 }
 0x4c0   :  { %v2921_v9 = vadd.f32 %v2920_v6, %v2919_v0  ;;  %v2938_v12 = vrot.slane %v2937_v30, 2 }
 0x4c1   :  { %v2933_v13 = vadd.f32 %v2932_v7, %v2931_v4  ;;  %v2927_v16 = vadd.f32 %v2926_v8, %v2925_v5  ;;  %v4143_v8 = vld [vmem:[%s5314_s13] ss:$0 sm:$0xff]  ;;  %s4600_s13 = smov [#allocation5]  }
 0x4c2   :  { %v2922_v22 = vrot.slane %v2921_v9, 1  ;;  %v2939_v23 = vadd.f32 %v2938_v12, %v2937_v30  ;;  %s3794_s5 = sshll.u32 %s4600_s13, 4  ;;  %s3795_s5 = int_to_ptr.vmem [resolvable:$true] %s3794_s5 }
 0x4c3   :  { %v2934_v24 = vrot.slane %v2933_v13, 1  ;;  %v2928_v25 = vrot.slane %v2927_v16, 1  ;;  %s4568_s30 = scalar_lea.vmem %s3795_s5, 128  ;;  %p4573_p9 = scmp.lt.s32.totalorder %s3795_s5, %s3795_s5 }
 0x4c4   :  { %v2923_v26 = vadd.f32 %v2922_v22, %v2921_v9  ;;  %v2940_v27 = vrot.slane %v2939_v23, 1  ;;  %p4569_p8 = scmp.ne.s32.totalorder %s3795_s5, %s4568_s30  ;;  %p4574_p10 = scmp.lt.s32.totalorder %s4568_s30, %s4568_s30 }
 0x4c5   :  { %v2935_v28 = vadd.f32 %v2934_v24, %v2933_v13  ;;  %v2929_v52 = vadd.f32 %v2928_v25, %v2927_v16 }
 0x4c6   :  { %v2946_v18 = vmul.f32 0.125, %v2923_v26  ;;  %v2941_v29 = vadd.f32 %v2940_v27, %v2939_v23  ;;  %p4575_p11 = por %p4574_p10, %p4573_p9 }
 0x4c7   :  { %v2948_v35 = vmul.f32 0.125, %v2935_v28  ;;  %v2947_v38 = vmul.f32 0.125, %v2929_v52 }
 0x4c8   :  { %v2954_v47 = vadd.f32 0.8, %v2946_v18  ;;  %v2949_v15 = vmul.f32 0.125, %v2941_v29  ;;  %p4576_p12 = pnand %p4575_p11, %p4569_p8 }
 0x4c9   :  { %v2956_v44 = vadd.f32 0.8, %v2948_v35  ;;  %v2955_v20 = vadd.f32 0.8, %v2947_v38 }
 0x4ca   :  { %4536 = vrsqrt.f32 %v2954_v47  ;;  %v2957_v19 = vadd.f32 0.8, %v2949_v15 }
 0x4cb   :  { %4538 = vrsqrt.f32 %v2956_v44 }
 0x4cc   :  { %4540 = vrsqrt.f32 %v2955_v20 }
 0x4cd   :  { %4542 = vrsqrt.f32 %v2957_v19 }
 0x4d4   :  { %v4537_v21 = vpop.eup %4536 }
 0x4d5   :  { %v4539_v17 = vpop.eup %4538  ;;  %v2970_v50 = vmul.f32 %v4537_v21, %v2882_v36 }
 0x4d6   :  { %v4541_v55 = vpop.eup %4540  ;;  %v2972_v33 = vmul.f32 %v4539_v17, %v2884_v59 }
 0x4d7   :  { %v4543_v57 = vpop.eup %4542  ;;  %v3020_v58 = vmul.f32 %v2995_v49, %v2970_v50  ;;  %v2971_v14 = vmul.f32 %v4541_v55, %v2883_v60 }
 0x4d8   :  { %v3022_v32 = vmul.f32 %v3003_v39, %v2972_v33  ;;  %v2973_v34 = vmul.f32 %v4543_v57, %v2885_v62 }
 0x4d9   :  { %v3070_v36 = vadd.f32 %v3045_v53, %v3020_v58  ;;  %v3021_v61 = vmul.f32 %v2999_v40, %v2971_v14 }
 0x4da   :  { %v3072_v63 = vadd.f32 %v3053_v3, %v3022_v32  ;;  %v3023_v41 = vmul.f32 %v3007_v56, %v2973_v34 }
 0x4db   :  { %v3071_v42 = vadd.f32 %v3049_v31, %v3021_v61  ;;  %vm3078_vm13 = vcmp.gt.f32.partialorder %v3070_v36, 0.0  ;;  %v3086_v59 = vmul.f32 0.2, %v3070_v36 }
 0x4dc   :  { %v3073_v43 = vadd.f32 %v3057_v37, %v3023_v41  ;;  %vm3080_vm14 = vcmp.gt.f32.partialorder %v3072_v63, 0.0  ;;  %v3088_v45 = vmul.f32 0.2, %v3072_v63 }
 0x4dd   :  { %vm3079_vm15 = vcmp.gt.f32.partialorder %v3071_v42, 0.0  ;;  %v3087_v10 = vmul.f32 0.2, %v3071_v42  ;;  %v3094_v46 = vsel %vm3078_vm13, %v3070_v36, %v3086_v59 }
 0x4de   :  { %vm3081_vm0 = vcmp.gt.f32.partialorder %v3073_v43, 0.0  ;;  %v3089_v60 = vmul.f32 0.2, %v3073_v43  ;;  %v3096_v2 = vsel %vm3080_vm14, %v3072_v63, %v3088_v45  ;;  %v3102_v5 = vpack.c.bf16 %v3094_v46, %v3094_v46 }
 0x4df   :  { %v3095_v0 = vsel %vm3079_vm15, %v3071_v42, %v3087_v10  ;;  %v3104_v6 = vpack.c.bf16 %v3096_v2, %v3096_v2 }
 0x4e0   :  { %v3103_v62 = vpack.c.bf16 %v3095_v0, %v3095_v0  ;;  %v3097_v4 = vsel %vm3081_vm0, %v3073_v43, %v3089_v60 }
 0x4e1   :  { %v3105_v11 = vpack.c.bf16 %v3097_v4, %v3097_v4 }
 0x4e2   :  { %3737 = vmatprep.mubr.bf16.mxu0 %v3103_v62 }
 0x4e3   :  { %3777 = vmatprep.mubr.bf16.mxu1 %v3105_v11  ;;  %3738 = vmatmul.mubr.bf16.vlgmr.msra.gmra.mrb[20].mxu0 %v3102_v5 }
 0x4e4   :  { %3778 = vmatmul.mubr.bf16.vlgmr.msra.gmra.mrb[20].mxu1 %v3104_v6 }
 0x536   :  { %v4227_v30 = vpop.f32.mrb[16].mxu0 }
 0x537   :  { %v4249_v7 = vpop.f32.mrb[16].mxu1  ;;  %v4228_v9 = vpop.f32.mrb[17].mxu0 }
 0x538   :  { %v4229_v12 = vadd.f32 %v4228_v9, %v4227_v30  ;;  %v4250_v13 = vpop.f32.mrb[17].mxu1  ;;  %v4230_v16 = vpop.f32.mrb[18].mxu0 }
 0x539   :  { %v4251_v22 = vadd.f32 %v4250_v13, %v4249_v7  ;;  %v4252_v23 = vpop.f32.mrb[18].mxu1  ;;  %v4231_v24 = vpop.f32.mrb[19].mxu0 }
 0x53a   :  { %v3660_v25 = vadd.f32 %v4229_v12, %v4143_v8  ;;  %v4253_v26 = vpop.f32.mrb[19].mxu1 }
 0x53c   :  { %v3700_v27 = vadd.f32 %v4251_v22, %v3660_v25 }
 0x5b6   :  { %v4271_v28 = vpop.f32.mrb[20].mxu0 }
 0x5b7   :  { %v4293_v52 = vpop.f32.mrb[20].mxu1  ;;  %v4272_v18 = vpop.f32.mrb[21].mxu0 }
 0x5b8   :  { %v4273_v29 = vadd.f32 %v4272_v18, %v4271_v28  ;;  %v4294_v35 = vpop.f32.mrb[21].mxu1  ;;  %v4274_v38 = vpop.f32.mrb[22].mxu0 }
 0x5b9   :  { %v4295_v47 = vadd.f32 %v4294_v35, %v4293_v52  ;;  %v4296_v15 = vpop.f32.mrb[22].mxu1  ;;  %v4275_v44 = vpop.f32.mrb[23].mxu0 }
 0x5ba   :  { %v3740_v20 = vadd.f32 %v4273_v29, %v3700_v27  ;;  %v4297_v19 = vpop.f32.mrb[23].mxu1 }
 0x5bc   :  { %v3780_v48 = vadd.f32 %v4295_v47, %v3740_v20 }
 0x5be   :  { %4544 = vtanh.f32 %v3780_v48 }
 0x5c8   :  { %v4545_v54 = vpop.eup %4544 }
 0x5c9   :  { %3787 = vst.msk [vmem:[#allocation5] sm:$0xff] %vm3786_vm1, %v4545_v54 }
 0x5ca   :  { %4579 = shalt.err (!%p4576_p12)
}
 0x5cb   :  { %s4580_s8 = scalar_lea.hbm %s5315_s14, 128 }
 0x5cc   :  { %p4581_p13 = scmp.ne.s32.totalorder %s5315_s14, %s4580_s8  ;;  %p4584_p0 = scmp.lt.u32.totalorder %s4580_s8, %s5315_s14 }
 0x5ce   :  { %p4586_p1 = pnand %p4584_p0, %p4581_p13 }
 0x5d0   :  { %4589 = shalt.err (!%p4586_p1)
}
 0x5d1   :  { %3797 = dma.vmem_to_hbm [thread:$0]  %s3795_s5, 128, %s5315_s14, [#allocation4]  }
 0x5d2   :  { %4592 = dma.done.wait [#allocation4], 128  }
 0x5d3   :  { %4593 = vsyncadd [#allocation4], 4294967168 }
 0x5d4   :  { %3801 = vsyncpa [#allocation3], 1 }
 0x5d5   :  { %3802 = vsyncpa [#allocation4], 1 }

</bundles_post_ra>
